<compile_context>
chip_gen: v5e
topology: v5e:2x2
jax: 0.10.0
libtpu: 0.0.40
codegen_flags: <defaults>
</compile_context>

<pallas_src>
import functools

import jax
import jax.numpy as jnp
import numpy as np
from jax.experimental import pallas as pl
from jax.experimental.pallas import tpu as pltpu

SELU_ALPHA = 1.6732632423543772
SELU_SCALE = 1.0507009873554805

# Raised scoped-VMEM limit: above the default on every chip, with headroom on
# v7x's 64 MiB physical VMEM.
_VMEM_LIMIT_BYTES = 48 * 1024 * 1024


# ---------------------------------------------------------------------------
# In-kernel helpers
# ---------------------------------------------------------------------------
def _selu(y):
    # exp(min(y, 0)) keeps the discarded branch finite for large positive y.
    neg = SELU_ALPHA * (jnp.exp(jnp.minimum(y, 0.0)) - 1.0)
    return SELU_SCALE * jnp.where(y > 0, y, neg)


def _linear_selu(h, w_ref, b_ref):
    # bf16 operands on the MXU, f32 accumulation, bias + SELU in f32.
    y = jnp.dot(h.astype(w_ref.dtype), w_ref[...],
                preferred_element_type=jnp.float32) + b_ref[...]
    return _selu(y)


def _mlp_chain(h, wb_refs):
    for w_ref, b_ref in wb_refs:
        h = _linear_selu(h, w_ref, b_ref)
    return h


def _row_tile(m, target):
    """Row tile: full extent when small, otherwise a multiple-of-8 tile used
    with a pl.cdiv grid (Pallas masks the partial last block)."""
    if m <= target:
        return m
    return max(8, (target // 8) * 8)


def _const_spec(arr):
    """Resident (constant-index) block: single pipeline buffer."""
    nd = arr.ndim
    return pl.BlockSpec(arr.shape, lambda *_: (0,) * nd,
                        pipeline_mode=pl.Buffered(1))


# ---------------------------------------------------------------------------
# Tier 1: fused (block-diagonal) fAddNet1 + fConnNet1 chain
# ---------------------------------------------------------------------------
def _tier1_kernel(*refs, n_layers):
    x_ref = refs[0]
    wb = [(refs[1 + 2 * i], refs[2 + 2 * i]) for i in range(n_layers)]
    o_ref = refs[1 + 2 * n_layers]
    # Single fused chain; columns [0:f_add] are fAddNet1, [f_add:] fConnNet1.
    o_ref[...] = _mlp_chain(x_ref[...], wb).astype(o_ref.dtype)


def tier1_forward(x_nodes, fused_layers):
    M, D = x_nodes.shape
    out_w = fused_layers[-1][0].shape[1]
    tile_m = _row_tile(M, 512)
    grid = (pl.cdiv(M, tile_m),)

    flat_inputs = [x_nodes]
    in_specs = [pl.BlockSpec((tile_m, D), lambda i: (i, 0))]
    for w, b in fused_layers:
        flat_inputs += [w, b]
        in_specs += [_const_spec(w), _const_spec(b)]

    kernel = functools.partial(_tier1_kernel, n_layers=len(fused_layers))
    return pl.pallas_call(
        kernel,
        out_shape=jax.ShapeDtypeStruct((M, out_w), jnp.bfloat16),
        grid=grid,
        in_specs=in_specs,
        out_specs=pl.BlockSpec((tile_m, out_w), lambda i: (i, 0)),
        compiler_params=pltpu.CompilerParams(
            dimension_semantics=("parallel",),
            vmem_limit_bytes=_VMEM_LIMIT_BYTES),
    )(*flat_inputs)


# ---------------------------------------------------------------------------
# Tier 2: fused fAddNet2 + fConnNet2 + fTermNet2.
#  * split-K first layers avoid materializing concat([f_*_1, graph_emb])
#  * three lane-aligned outputs (no masked mid-row slab writes)
#  * batch rows tiled + "parallel"
# ---------------------------------------------------------------------------
def _tier2_kernel(*refs, n_add_rest, n_conn_rest, n_term):
    fa_ref, fc_ref, g_ref = refs[0], refs[1], refs[2]
    idx = 3

    wa_top, wa_bot, ba0 = refs[idx], refs[idx + 1], refs[idx + 2]
    idx += 3
    add_rest = [(refs[idx + 2 * i], refs[idx + 2 * i + 1])
                for i in range(n_add_rest)]
    idx += 2 * n_add_rest

    wc_top, wc_bot, bc0 = refs[idx], refs[idx + 1], refs[idx + 2]
    idx += 3
    conn_rest = [(refs[idx + 2 * i], refs[idx + 2 * i + 1])
                 for i in range(n_conn_rest)]
    idx += 2 * n_conn_rest

    term_wb = [(refs[idx + 2 * i], refs[idx + 2 * i + 1])
               for i in range(n_term)]
    idx += 2 * n_term

    o_add_ref, o_conn_ref, o_term_ref = refs[idx], refs[idx + 1], refs[idx + 2]

    g = g_ref[...]  # already bf16 (cast once in the wrapper), reused 3 times

    def split_first(x_ref, w_top_ref, w_bot_ref, b_ref):
        # Equivalent to concat([x, g], 1) @ W + b, without the HBM concat.
        y = (jnp.dot(x_ref[...], w_top_ref[...],
                     preferred_element_type=jnp.float32)
             + jnp.dot(g, w_bot_ref[...], preferred_element_type=jnp.float32)
             + b_ref[...])
        return _selu(y)

    o_add_ref[...] = _mlp_chain(split_first(fa_ref, wa_top, wa_bot, ba0),
                                add_rest).astype(o_add_ref.dtype)
    o_conn_ref[...] = _mlp_chain(split_first(fc_ref, wc_top, wc_bot, bc0),
                                 conn_rest).astype(o_conn_ref.dtype)
    o_term_ref[...] = _mlp_chain(g, term_wb).astype(o_term_ref.dtype)


def tier2_forward(f_add_1, f_conn_1, graph_emb,
                  add2_first, add2_rest, conn2_first, conn2_rest, term2):
    B, G = graph_emb.shape
    Ka = f_add_1.shape[1]
    Kc = f_conn_1.shape[1]
    out_add = add2_rest[-1][0].shape[1] if add2_rest else add2_first[2].shape[1]
    out_conn = conn2_rest[-1][0].shape[1] if conn2_rest else conn2_first[2].shape[1]
    out_term = term2[-1][0].shape[1]

    tile_b = _row_tile(B, 128)
    grid = (pl.cdiv(B, tile_b),)

    flat_inputs = [f_add_1, f_conn_1, graph_emb]
    in_specs = [pl.BlockSpec((tile_b, Ka), lambda i: (i, 0)),
                pl.BlockSpec((tile_b, Kc), lambda i: (i, 0)),
                pl.BlockSpec((tile_b, G), lambda i: (i, 0))]

    # TODO(synk): for production mlp2 sizes on v7x (64 MiB VMEM per TC), tile
    # the first-layer K axis and last-layer output-N axis with an accumulator
    # grid instead of whole-array resident weight blocks.
    for arr in add2_first:
        flat_inputs.append(arr)
        in_specs.append(_const_spec(arr))
    for w, b in add2_rest:
        flat_inputs += [w, b]
        in_specs += [_const_spec(w), _const_spec(b)]
    for arr in conn2_first:
        flat_inputs.append(arr)
        in_specs.append(_const_spec(arr))
    for w, b in conn2_rest:
        flat_inputs += [w, b]
        in_specs += [_const_spec(w), _const_spec(b)]
    for w, b in term2:
        flat_inputs += [w, b]
        in_specs += [_const_spec(w), _const_spec(b)]

    kernel = functools.partial(_tier2_kernel,
                               n_add_rest=len(add2_rest),
                               n_conn_rest=len(conn2_rest),
                               n_term=len(term2))
    out_shape = (jax.ShapeDtypeStruct((B, out_add), jnp.float32),
                 jax.ShapeDtypeStruct((B, out_conn), jnp.float32),
                 jax.ShapeDtypeStruct((B, out_term), jnp.float32))
    out_specs = (pl.BlockSpec((tile_b, out_add), lambda i: (i, 0)),
                 pl.BlockSpec((tile_b, out_conn), lambda i: (i, 0)),
                 pl.BlockSpec((tile_b, out_term), lambda i: (i, 0)))

    return pl.pallas_call(
        kernel,
        out_shape=out_shape,
        grid=grid,
        in_specs=in_specs,
        out_specs=out_specs,
        compiler_params=pltpu.CompilerParams(
            dimension_semantics=("parallel",),
            vmem_limit_bytes=_VMEM_LIMIT_BYTES),
    )(*flat_inputs)


# ---------------------------------------------------------------------------
# Parameters.  Weights stored as (in, out) bf16 (MXU operands); biases stored
# pre-reshaped to (1, out) f32.
# ---------------------------------------------------------------------------
def init_mlp_params(key, in_features, hidden_layer_sizes, out_features):
    fs = [in_features, *hidden_layer_sizes, out_features]
    params = []
    for in_f, out_f in zip(fs, fs[1:]):
        key, kw, kb = jax.random.split(key, 3)
        std = (2.0 / (in_f + out_f)) ** 0.5   # xavier-normal-like ('normal' init)
        w = (std * jax.random.normal(kw, (in_f, out_f), jnp.float32)
             ).astype(jnp.bfloat16)
        b = (0.01 * jax.random.normal(kb, (out_f,), jnp.float32)
             ).reshape(1, out_f)
        params.append((w, b))
    return key, params


def make_global_readout_params(key, *, f_add_elems, f_conn_elems, f_term_elems,
                               mlp1_depth, mlp1_hidden_dim, mlp2_depth,
                               mlp2_hidden_dim, graph_emb_size, max_n_nodes,
                               node_emb_size):
    params = {}
    key, params["fAddNet1"] = init_mlp_params(
        key, node_emb_size, [mlp1_hidden_dim] * mlp1_depth, f_add_elems)
    key, params["fConnNet1"] = init_mlp_params(
        key, node_emb_size, [mlp1_hidden_dim] * mlp1_depth, f_conn_elems)
    key, params["fAddNet2"] = init_mlp_params(
        key, max_n_nodes * f_add_elems + graph_emb_size,
        [mlp2_hidden_dim] * mlp2_depth, f_add_elems * max_n_nodes)
    key, params["fConnNet2"] = init_mlp_params(
        key, max_n_nodes * f_conn_elems + graph_emb_size,
        [mlp2_hidden_dim] * mlp2_depth, f_conn_elems * max_n_nodes)
    key, params["fTermNet2"] = init_mlp_params(
        key, graph_emb_size, [mlp2_hidden_dim] * mlp2_depth, f_term_elems)
    return params


def _block_diag(wa, wc):
    top = jnp.concatenate(
        [wa, jnp.zeros((wa.shape[0], wc.shape[1]), wa.dtype)], axis=1)
    bot = jnp.concatenate(
        [jnp.zeros((wc.shape[0], wa.shape[1]), wc.dtype), wc], axis=1)
    return jnp.concatenate([top, bot], axis=0)


def prepare_global_readout_params(params):
    """One-time restructuring of raw per-MLP params for the fused kernels.

    NOTE: weights here are stored (in, out).  PyTorch nn.Linear stores
    (out, in): transpose before importing, otherwise the split-K row split at
    Ka/Kc silently computes the wrong product.
    """
    add1, conn1 = params["fAddNet1"], params["fConnNet1"]
    assert len(add1) == len(conn1)
    tier1 = []
    for li, ((wa, ba), (wc, bc)) in enumerate(zip(add1, conn1)):
        if li == 0:
            w = jnp.concatenate([wa, wc], axis=1)        # shared input
        else:
            w = _block_diag(wa, wc)                      # independent chains
        b = jnp.concatenate([ba, bc], axis=1)
        tier1.append((w, b))

    graph_emb_size = params["fTermNet2"][0][0].shape[0]

    def split_first(mlp_params):
        (w0, b0) = mlp_params[0]
        k_main = w0.shape[0] - graph_emb_size
        return (w0[:k_main], w0[k_main:], b0), list(mlp_params[1:])

    add2_first, add2_rest = split_first(params["fAddNet2"])
    conn2_first, conn2_rest = split_first(params["fConnNet2"])

    return {"tier1": tier1,
            "add2_first": add2_first, "add2_rest": add2_rest,
            "conn2_first": conn2_first, "conn2_rest": conn2_rest,
            "term2": list(params["fTermNet2"])}


# ---------------------------------------------------------------------------
# GlobalReadout forward (matches the PyTorch reference: SELU after every
# linear layer of every MLP; AlphaDropout is inference-mode identity).
# ---------------------------------------------------------------------------
@jax.jit
def global_readout_forward(prepared, node_level_output, graph_embedding_batch):
    B, N, D = node_level_output.shape

    # Tier 1: one fused node-level MLP chain, bf16 lane-dense output slab.
    x_nodes = node_level_output.reshape(B * N, D)
    fused = tier1_forward(x_nodes, prepared["tier1"])      # (B*N, Fa+Fc) bf16

    # Split the slab and flatten per graph (== torch .view((B, N*f))).
    Fa = prepared["add2_first"][0].shape[0] // N
    Fc = prepared["conn2_first"][0].shape[0] // N
    fused = fused.reshape(B, N, Fa + Fc)
    f_add_1 = fused[:, :, :Fa].reshape(B, N * Fa)
    f_conn_1 = fused[:, :, Fa:].reshape(B, N * Fc)

    # Cast the graph embedding once; all Tier-2 matmuls consume it as bf16.
    g_bf16 = graph_embedding_batch.astype(jnp.bfloat16)

    # Tier 2: three fused heads, lane-aligned outputs.
    f_add_2, f_conn_2, f_term_2 = tier2_forward(
        f_add_1, f_conn_1, g_bf16,
        prepared["add2_first"], prepared["add2_rest"],
        prepared["conn2_first"], prepared["conn2_rest"],
        prepared["term2"])

    # Final APD (same order as the torch.cat in the reference).
    return jnp.concatenate([f_add_2, f_conn_2, f_term_2], axis=1)


# ---------------------------------------------------------------------------
# Pure-JAX reference mirroring the original torch module layer-by-layer
# (same bf16-before-matmul discipline, so tolerances can stay tight).
# ---------------------------------------------------------------------------
def _mlp_ref(h, layers):
    for w, b in layers:
        y = jnp.dot(h.astype(w.dtype), w, preferred_element_type=jnp.float32) + b
        h = _selu(y)
    return h


def reference_forward(params, node_level_output, graph_embedding_batch):
    B, N, D = node_level_output.shape
    x = node_level_output.reshape(B * N, D)
    f_add_1 = _mlp_ref(x, params["fAddNet1"]).reshape(B, -1)
    f_conn_1 = _mlp_ref(x, params["fConnNet1"]).reshape(B, -1)
    g = graph_embedding_batch
    f_add_2 = _mlp_ref(jnp.concatenate(
        [f_add_1.astype(jnp.bfloat16).astype(jnp.float32), g], axis=1),
        params["fAddNet2"])
    f_conn_2 = _mlp_ref(jnp.concatenate(
        [f_conn_1.astype(jnp.bfloat16).astype(jnp.float32), g], axis=1),
        params["fConnNet2"])
    f_term_2 = _mlp_ref(g, params["fTermNet2"])
    return jnp.concatenate([f_add_2, f_conn_2, f_term_2], axis=1)


if __name__ == "__main__":
    # Small synthetic configuration consistent with the module's __init__.
    B = 2
    max_n_nodes = 8
    node_emb_size = 32
    graph_emb_size = 32
    f_add_elems = 16
    f_conn_elems = 8
    f_term_elems = 1
    mlp1_depth, mlp1_hidden_dim = 2, 32
    mlp2_depth, mlp2_hidden_dim = 2, 32

    key = jax.random.PRNGKey(0)
    key, k_nodes, k_graph = jax.random.split(key, 3)

    node_level_output = jax.random.normal(
        k_nodes, (B, max_n_nodes, node_emb_size), jnp.float32)
    graph_embedding_batch = jax.random.normal(
        k_graph, (B, graph_emb_size), jnp.float32)

    params = make_global_readout_params(
        key,
        f_add_elems=f_add_elems, f_conn_elems=f_conn_elems,
        f_term_elems=f_term_elems,
        mlp1_depth=mlp1_depth, mlp1_hidden_dim=mlp1_hidden_dim,
        mlp2_depth=mlp2_depth, mlp2_hidden_dim=mlp2_hidden_dim,
        graph_emb_size=graph_emb_size, max_n_nodes=max_n_nodes,
        node_emb_size=node_emb_size)

    prepared = prepare_global_readout_params(params)

    out = global_readout_forward(prepared, node_level_output,
                                 graph_embedding_batch)
    out = jax.block_until_ready(out)

    expected_cols = (max_n_nodes * f_add_elems
                     + max_n_nodes * f_conn_elems
                     + f_term_elems)
    assert out.shape == (B, expected_cols), out.shape
    assert jnp.all(jnp.isfinite(out))

    ref = reference_forward(params, node_level_output, graph_embedding_batch)
    np.testing.assert_allclose(np.asarray(out), np.asarray(ref),
                               rtol=1e-2, atol=1e-2)
    print("KERNEL_OK")
</pallas_src>

<mosaic_0001>
module attributes {stable_mosaic.version = 11 : i64} {
  func.func @_tier1_kernel(%arg0: i32, %arg1: memref<16x32xf32, #tpu.memory_space<vmem>>, %arg2: memref<32x64xbf16, #tpu.memory_space<vmem>>, %arg3: memref<1x64xf32, #tpu.memory_space<vmem>>, %arg4: memref<64x64xbf16, #tpu.memory_space<vmem>>, %arg5: memref<1x64xf32, #tpu.memory_space<vmem>>, %arg6: memref<64x24xbf16, #tpu.memory_space<vmem>>, %arg7: memref<1x24xf32, #tpu.memory_space<vmem>>, %arg8: memref<16x24xbf16, #tpu.memory_space<vmem>>) attributes {dimension_semantics = [#tpu.dimension_semantics<parallel>], iteration_bounds = array<i64: 1>, scalar_prefetch = 0 : i64, scratch_operands = 0 : i64, tpu.core_type = #tpu.core_type<tc>, window_params = [{transform_indices = @transform_0, window_bounds = array<i64: 16, 32>}, {pipeline_mode = #tpu.pipeline_mode<synchronous>, transform_indices = @transform_1, window_bounds = array<i64: 32, 64>}, {pipeline_mode = #tpu.pipeline_mode<synchronous>, transform_indices = @transform_2, window_bounds = array<i64: 1, 64>}, {pipeline_mode = #tpu.pipeline_mode<synchronous>, transform_indices = @transform_3, window_bounds = array<i64: 64, 64>}, {pipeline_mode = #tpu.pipeline_mode<synchronous>, transform_indices = @transform_4, window_bounds = array<i64: 1, 64>}, {pipeline_mode = #tpu.pipeline_mode<synchronous>, transform_indices = @transform_5, window_bounds = array<i64: 64, 24>}, {pipeline_mode = #tpu.pipeline_mode<synchronous>, transform_indices = @transform_6, window_bounds = array<i64: 1, 24>}, {transform_indices = @transform_7, window_bounds = array<i64: 16, 24>}]} {
    %c0 = arith.constant 0 : index
    %c0_0 = arith.constant 0 : index
    %0 = vector.load %arg1[%c0, %c0_0] : memref<16x32xf32, #tpu.memory_space<vmem>>, vector<16x32xf32>
    %1 = arith.truncf %0 : vector<16x32xf32> to vector<16x32xbf16>
    %c0_1 = arith.constant 0 : index
    %c0_2 = arith.constant 0 : index
    %2 = vector.load %arg2[%c0_1, %c0_2] : memref<32x64xbf16, #tpu.memory_space<vmem>>, vector<32x64xbf16>
    %cst = arith.constant dense<0.000000e+00> : vector<16x64xf32>
    %3 = tpu.matmul %1, %2, %cst {dimension_numbers = #tpu.dot_dimension_numbers<[1], [0], [0], [1], [0, 0, 1, 1], [], []>} : vector<16x32xbf16>, vector<32x64xbf16>, vector<16x64xf32> -> vector<16x64xf32>
    %c0_3 = arith.constant 0 : index
    %c0_4 = arith.constant 0 : index
    %4 = vector.load %arg3[%c0_3, %c0_4] : memref<1x64xf32, #tpu.memory_space<vmem>>, vector<1x64xf32>
    %5 = vector.broadcast %4 : vector<1x64xf32> to vector<16x64xf32>
    %6 = arith.addf %3, %5 : vector<16x64xf32>
    %cst_5 = arith.constant 0.000000e+00 : f32
    %7 = vector.broadcast %cst_5 : f32 to vector<16x64xf32>
    %8 = arith.minimumf %6, %7 : vector<16x64xf32>
    %9 = math.exp %8 : vector<16x64xf32>
    %cst_6 = arith.constant 1.000000e+00 : f32
    %10 = vector.broadcast %cst_6 : f32 to vector<16x64xf32>
    %11 = arith.subf %9, %10 : vector<16x64xf32>
    %cst_7 = arith.constant 1.67326319 : f32
    %12 = vector.broadcast %cst_7 : f32 to vector<16x64xf32>
    %13 = arith.mulf %12, %11 : vector<16x64xf32>
    %cst_8 = arith.constant 0.000000e+00 : f32
    %14 = vector.broadcast %cst_8 : f32 to vector<16x64xf32>
    %15 = arith.cmpf ogt, %6, %14 : vector<16x64xf32>
    %16 = arith.select %15, %6, %13 : vector<16x64xi1>, vector<16x64xf32>
    %cst_9 = arith.constant 1.05070102 : f32
    %17 = vector.broadcast %cst_9 : f32 to vector<16x64xf32>
    %18 = arith.mulf %17, %16 : vector<16x64xf32>
    %19 = arith.truncf %18 : vector<16x64xf32> to vector<16x64xbf16>
    %c0_10 = arith.constant 0 : index
    %c0_11 = arith.constant 0 : index
    %20 = vector.load %arg4[%c0_10, %c0_11] : memref<64x64xbf16, #tpu.memory_space<vmem>>, vector<64x64xbf16>
    %cst_12 = arith.constant dense<0.000000e+00> : vector<16x64xf32>
    %21 = tpu.matmul %19, %20, %cst_12 {dimension_numbers = #tpu.dot_dimension_numbers<[1], [0], [0], [1], [0, 0, 1, 1], [], []>} : vector<16x64xbf16>, vector<64x64xbf16>, vector<16x64xf32> -> vector<16x64xf32>
    %c0_13 = arith.constant 0 : index
    %c0_14 = arith.constant 0 : index
    %22 = vector.load %arg5[%c0_13, %c0_14] : memref<1x64xf32, #tpu.memory_space<vmem>>, vector<1x64xf32>
    %23 = vector.broadcast %22 : vector<1x64xf32> to vector<16x64xf32>
    %24 = arith.addf %21, %23 : vector<16x64xf32>
    %cst_15 = arith.constant 0.000000e+00 : f32
    %25 = vector.broadcast %cst_15 : f32 to vector<16x64xf32>
    %26 = arith.minimumf %24, %25 : vector<16x64xf32>
    %27 = math.exp %26 : vector<16x64xf32>
    %cst_16 = arith.constant 1.000000e+00 : f32
    %28 = vector.broadcast %cst_16 : f32 to vector<16x64xf32>
    %29 = arith.subf %27, %28 : vector<16x64xf32>
    %cst_17 = arith.constant 1.67326319 : f32
    %30 = vector.broadcast %cst_17 : f32 to vector<16x64xf32>
    %31 = arith.mulf %30, %29 : vector<16x64xf32>
    %cst_18 = arith.constant 0.000000e+00 : f32
    %32 = vector.broadcast %cst_18 : f32 to vector<16x64xf32>
    %33 = arith.cmpf ogt, %24, %32 : vector<16x64xf32>
    %34 = arith.select %33, %24, %31 : vector<16x64xi1>, vector<16x64xf32>
    %cst_19 = arith.constant 1.05070102 : f32
    %35 = vector.broadcast %cst_19 : f32 to vector<16x64xf32>
    %36 = arith.mulf %35, %34 : vector<16x64xf32>
    %37 = arith.truncf %36 : vector<16x64xf32> to vector<16x64xbf16>
    %c0_20 = arith.constant 0 : index
    %c0_21 = arith.constant 0 : index
    %38 = vector.load %arg6[%c0_20, %c0_21] : memref<64x24xbf16, #tpu.memory_space<vmem>>, vector<64x24xbf16>
    %cst_22 = arith.constant dense<0.000000e+00> : vector<16x24xf32>
    %39 = tpu.matmul %37, %38, %cst_22 {dimension_numbers = #tpu.dot_dimension_numbers<[1], [0], [0], [1], [0, 0, 1, 1], [], []>} : vector<16x64xbf16>, vector<64x24xbf16>, vector<16x24xf32> -> vector<16x24xf32>
    %c0_23 = arith.constant 0 : index
    %c0_24 = arith.constant 0 : index
    %40 = vector.load %arg7[%c0_23, %c0_24] : memref<1x24xf32, #tpu.memory_space<vmem>>, vector<1x24xf32>
    %41 = vector.broadcast %40 : vector<1x24xf32> to vector<16x24xf32>
    %42 = arith.addf %39, %41 : vector<16x24xf32>
    %cst_25 = arith.constant 0.000000e+00 : f32
    %43 = vector.broadcast %cst_25 : f32 to vector<16x24xf32>
    %44 = arith.minimumf %42, %43 : vector<16x24xf32>
    %45 = math.exp %44 : vector<16x24xf32>
    %cst_26 = arith.constant 1.000000e+00 : f32
    %46 = vector.broadcast %cst_26 : f32 to vector<16x24xf32>
    %47 = arith.subf %45, %46 : vector<16x24xf32>
    %cst_27 = arith.constant 1.67326319 : f32
    %48 = vector.broadcast %cst_27 : f32 to vector<16x24xf32>
    %49 = arith.mulf %48, %47 : vector<16x24xf32>
    %cst_28 = arith.constant 0.000000e+00 : f32
    %50 = vector.broadcast %cst_28 : f32 to vector<16x24xf32>
    %51 = arith.cmpf ogt, %42, %50 : vector<16x24xf32>
    %52 = arith.select %51, %42, %49 : vector<16x24xi1>, vector<16x24xf32>
    %cst_29 = arith.constant 1.05070102 : f32
    %53 = vector.broadcast %cst_29 : f32 to vector<16x24xf32>
    %54 = arith.mulf %53, %52 : vector<16x24xf32>
    %55 = arith.truncf %54 : vector<16x24xf32> to vector<16x24xbf16>
    %c0_30 = arith.constant 0 : index
    %c0_31 = arith.constant 0 : index
    %56 = vector.load %arg8[%c0_30, %c0_31] : memref<16x24xbf16, #tpu.memory_space<vmem>>, vector<16x24xbf16>
    tpu.vector_store %arg8[%c0_30, %c0_31], %55 {strides = array<i32>} : memref<16x24xbf16, #tpu.memory_space<vmem>>, vector<16x24xbf16>,
    return
  }
  func.func @transform_0(%arg0: i32) -> (i32, i32) {
    %c0_i32 = arith.constant 0 : i32
    %c0_i32_0 = arith.constant 0 : i32
    return %arg0, %c0_i32 : i32, i32
  }
  func.func @transform_1(%arg0: i32) -> (i32, i32) {
    %c0_i32 = arith.constant 0 : i32
    %c0_i32_0 = arith.constant 0 : i32
    %c0_i32_1 = arith.constant 0 : i32
    return %c0_i32, %c0_i32_0 : i32, i32
  }
  func.func @transform_2(%arg0: i32) -> (i32, i32) {
    %c0_i32 = arith.constant 0 : i32
    %c0_i32_0 = arith.constant 0 : i32
    %c0_i32_1 = arith.constant 0 : i32
    return %c0_i32, %c0_i32_0 : i32, i32
  }
  func.func @transform_3(%arg0: i32) -> (i32, i32) {
    %c0_i32 = arith.constant 0 : i32
    %c0_i32_0 = arith.constant 0 : i32
    %c0_i32_1 = arith.constant 0 : i32
    return %c0_i32, %c0_i32_0 : i32, i32
  }
  func.func @transform_4(%arg0: i32) -> (i32, i32) {
    %c0_i32 = arith.constant 0 : i32
    %c0_i32_0 = arith.constant 0 : i32
    %c0_i32_1 = arith.constant 0 : i32
    return %c0_i32, %c0_i32_0 : i32, i32
  }
  func.func @transform_5(%arg0: i32) -> (i32, i32) {
    %c0_i32 = arith.constant 0 : i32
    %c0_i32_0 = arith.constant 0 : i32
    %c0_i32_1 = arith.constant 0 : i32
    return %c0_i32, %c0_i32_0 : i32, i32
  }
  func.func @transform_6(%arg0: i32) -> (i32, i32) {
    %c0_i32 = arith.constant 0 : i32
    %c0_i32_0 = arith.constant 0 : i32
    %c0_i32_1 = arith.constant 0 : i32
    return %c0_i32, %c0_i32_0 : i32, i32
  }
  func.func @transform_7(%arg0: i32) -> (i32, i32) {
    %c0_i32 = arith.constant 0 : i32
    %c0_i32_0 = arith.constant 0 : i32
    return %arg0, %c0_i32 : i32, i32
  }
}

module attributes {stable_mosaic.version = 11 : i64} {
  func.func @_tier2_kernel(%arg0: i32, %arg1: memref<2x128xbf16, #tpu.memory_space<vmem>>, %arg2: memref<2x64xbf16, #tpu.memory_space<vmem>>, %arg3: memref<2x32xbf16, #tpu.memory_space<vmem>>, %arg4: memref<128x32xbf16, #tpu.memory_space<vmem>>, %arg5: memref<32x32xbf16, #tpu.memory_space<vmem>>, %arg6: memref<1x32xf32, #tpu.memory_space<vmem>>, %arg7: memref<32x32xbf16, #tpu.memory_space<vmem>>, %arg8: memref<1x32xf32, #tpu.memory_space<vmem>>, %arg9: memref<32x128xbf16, #tpu.memory_space<vmem>>, %arg10: memref<1x128xf32, #tpu.memory_space<vmem>>, %arg11: memref<64x32xbf16, #tpu.memory_space<vmem>>, %arg12: memref<32x32xbf16, #tpu.memory_space<vmem>>, %arg13: memref<1x32xf32, #tpu.memory_space<vmem>>, %arg14: memref<32x32xbf16, #tpu.memory_space<vmem>>, %arg15: memref<1x32xf32, #tpu.memory_space<vmem>>, %arg16: memref<32x64xbf16, #tpu.memory_space<vmem>>, %arg17: memref<1x64xf32, #tpu.memory_space<vmem>>, %arg18: memref<32x32xbf16, #tpu.memory_space<vmem>>, %arg19: memref<1x32xf32, #tpu.memory_space<vmem>>, %arg20: memref<32x32xbf16, #tpu.memory_space<vmem>>, %arg21: memref<1x32xf32, #tpu.memory_space<vmem>>, %arg22: memref<32x1xbf16, #tpu.memory_space<vmem>>, %arg23: memref<1x1xf32, #tpu.memory_space<vmem>>, %arg24: memref<2x128xf32, #tpu.memory_space<vmem>>, %arg25: memref<2x64xf32, #tpu.memory_space<vmem>>, %arg26: memref<2x1xf32, #tpu.memory_space<vmem>>) attributes {dimension_semantics = [#tpu.dimension_semantics<parallel>], iteration_bounds = array<i64: 1>, scalar_prefetch = 0 : i64, scratch_operands = 0 : i64, tpu.core_type = #tpu.core_type<tc>, window_params = [{transform_indices = @transform_0, window_bounds = array<i64: 2, 128>}, {transform_indices = @transform_1, window_bounds = array<i64: 2, 64>}, {transform_indices = @transform_2, window_bounds = array<i64: 2, 32>}, {pipeline_mode = #tpu.pipeline_mode<synchronous>, transform_indices = @transform_3, window_bounds = array<i64: 128, 32>}, {pipeline_mode = #tpu.pipeline_mode<synchronous>, transform_indices = @transform_4, window_bounds = array<i64: 32, 32>}, {pipeline_mode = #tpu.pipeline_mode<synchronous>, transform_indices = @transform_5, window_bounds = array<i64: 1, 32>}, {pipeline_mode = #tpu.pipeline_mode<synchronous>, transform_indices = @transform_6, window_bounds = array<i64: 32, 32>}, {pipeline_mode = #tpu.pipeline_mode<synchronous>, transform_indices = @transform_7, window_bounds = array<i64: 1, 32>}, {pipeline_mode = #tpu.pipeline_mode<synchronous>, transform_indices = @transform_8, window_bounds = array<i64: 32, 128>}, {pipeline_mode = #tpu.pipeline_mode<synchronous>, transform_indices = @transform_9, window_bounds = array<i64: 1, 128>}, {pipeline_mode = #tpu.pipeline_mode<synchronous>, transform_indices = @transform_10, window_bounds = array<i64: 64, 32>}, {pipeline_mode = #tpu.pipeline_mode<synchronous>, transform_indices = @transform_11, window_bounds = array<i64: 32, 32>}, {pipeline_mode = #tpu.pipeline_mode<synchronous>, transform_indices = @transform_12, window_bounds = array<i64: 1, 32>}, {pipeline_mode = #tpu.pipeline_mode<synchronous>, transform_indices = @transform_13, window_bounds = array<i64: 32, 32>}, {pipeline_mode = #tpu.pipeline_mode<synchronous>, transform_indices = @transform_14, window_bounds = array<i64: 1, 32>}, {pipeline_mode = #tpu.pipeline_mode<synchronous>, transform_indices = @transform_15, window_bounds = array<i64: 32, 64>}, {pipeline_mode = #tpu.pipeline_mode<synchronous>, transform_indices = @transform_16, window_bounds = array<i64: 1, 64>}, {pipeline_mode = #tpu.pipeline_mode<synchronous>, transform_indices = @transform_17, window_bounds = array<i64: 32, 32>}, {pipeline_mode = #tpu.pipeline_mode<synchronous>, transform_indices = @transform_18, window_bounds = array<i64: 1, 32>}, {pipeline_mode = #tpu.pipeline_mode<synchronous>, transform_indices = @transform_19, window_bounds = array<i64: 32, 32>}, {pipeline_mode = #tpu.pipeline_mode<synchronous>, transform_indices = @transform_20, window_bounds = array<i64: 1, 32>}, {pipeline_mode = #tpu.pipeline_mode<synchronous>, transform_indices = @transform_21, window_bounds = array<i64: 32, 1>}, {pipeline_mode = #tpu.pipeline_mode<synchronous>, transform_indices = @transform_22, window_bounds = array<i64: 1, 1>}, {transform_indices = @transform_23, window_bounds = array<i64: 2, 128>}, {transform_indices = @transform_24, window_bounds = array<i64: 2, 64>}, {transform_indices = @transform_25, window_bounds = array<i64: 2, 1>}]} {
    %c0 = arith.constant 0 : index
    %c0_0 = arith.constant 0 : index
    %0 = vector.load %arg3[%c0, %c0_0] : memref<2x32xbf16, #tpu.memory_space<vmem>>, vector<2x32xbf16>
    %c0_1 = arith.constant 0 : index
    %c0_2 = arith.constant 0 : index
    %1 = vector.load %arg1[%c0_1, %c0_2] : memref<2x128xbf16, #tpu.memory_space<vmem>>, vector<2x128xbf16>
    %c0_3 = arith.constant 0 : index
    %c0_4 = arith.constant 0 : index
    %2 = vector.load %arg4[%c0_3, %c0_4] : memref<128x32xbf16, #tpu.memory_space<vmem>>, vector<128x32xbf16>
    %cst = arith.constant dense<0.000000e+00> : vector<2x32xf32>
    %3 = tpu.matmul %1, %2, %cst {dimension_numbers = #tpu.dot_dimension_numbers<[1], [0], [0], [1], [0, 0, 1, 1], [], []>} : vector<2x128xbf16>, vector<128x32xbf16>, vector<2x32xf32> -> vector<2x32xf32>
    %c0_5 = arith.constant 0 : index
    %c0_6 = arith.constant 0 : index
    %4 = vector.load %arg5[%c0_5, %c0_6] : memref<32x32xbf16, #tpu.memory_space<vmem>>, vector<32x32xbf16>
    %cst_7 = arith.constant dense<0.000000e+00> : vector<2x32xf32>
    %5 = tpu.matmul %0, %4, %cst_7 {dimension_numbers = #tpu.dot_dimension_numbers<[1], [0], [0], [1], [0, 0, 1, 1], [], []>} : vector<2x32xbf16>, vector<32x32xbf16>, vector<2x32xf32> -> vector<2x32xf32>
    %6 = arith.addf %3, %5 : vector<2x32xf32>
    %c0_8 = arith.constant 0 : index
    %c0_9 = arith.constant 0 : index
    %7 = vector.load %arg6[%c0_8, %c0_9] : memref<1x32xf32, #tpu.memory_space<vmem>>, vector<1x32xf32>
    %8 = vector.broadcast %7 : vector<1x32xf32> to vector<2x32xf32>
    %9 = arith.addf %6, %8 : vector<2x32xf32>
    %cst_10 = arith.constant 0.000000e+00 : f32
    %10 = vector.broadcast %cst_10 : f32 to vector<2x32xf32>
    %11 = arith.minimumf %9, %10 : vector<2x32xf32>
    %12 = math.exp %11 : vector<2x32xf32>
    %cst_11 = arith.constant 1.000000e+00 : f32
    %13 = vector.broadcast %cst_11 : f32 to vector<2x32xf32>
    %14 = arith.subf %12, %13 : vector<2x32xf32>
    %cst_12 = arith.constant 1.67326319 : f32
    %15 = vector.broadcast %cst_12 : f32 to vector<2x32xf32>
    %16 = arith.mulf %15, %14 : vector<2x32xf32>
    %cst_13 = arith.constant 0.000000e+00 : f32
    %17 = vector.broadcast %cst_13 : f32 to vector<2x32xf32>
    %18 = arith.cmpf ogt, %9, %17 : vector<2x32xf32>
    %19 = arith.select %18, %9, %16 : vector<2x32xi1>, vector<2x32xf32>
    %cst_14 = arith.constant 1.05070102 : f32
    %20 = vector.broadcast %cst_14 : f32 to vector<2x32xf32>
    %21 = arith.mulf %20, %19 : vector<2x32xf32>
    %22 = arith.truncf %21 : vector<2x32xf32> to vector<2x32xbf16>
    %c0_15 = arith.constant 0 : index
    %c0_16 = arith.constant 0 : index
    %23 = vector.load %arg7[%c0_15, %c0_16] : memref<32x32xbf16, #tpu.memory_space<vmem>>, vector<32x32xbf16>
    %cst_17 = arith.constant dense<0.000000e+00> : vector<2x32xf32>
    %24 = tpu.matmul %22, %23, %cst_17 {dimension_numbers = #tpu.dot_dimension_numbers<[1], [0], [0], [1], [0, 0, 1, 1], [], []>} : vector<2x32xbf16>, vector<32x32xbf16>, vector<2x32xf32> -> vector<2x32xf32>
    %c0_18 = arith.constant 0 : index
    %c0_19 = arith.constant 0 : index
    %25 = vector.load %arg8[%c0_18, %c0_19] : memref<1x32xf32, #tpu.memory_space<vmem>>, vector<1x32xf32>
    %26 = vector.broadcast %25 : vector<1x32xf32> to vector<2x32xf32>
    %27 = arith.addf %24, %26 : vector<2x32xf32>
    %cst_20 = arith.constant 0.000000e+00 : f32
    %28 = vector.broadcast %cst_20 : f32 to vector<2x32xf32>
    %29 = arith.minimumf %27, %28 : vector<2x32xf32>
    %30 = math.exp %29 : vector<2x32xf32>
    %cst_21 = arith.constant 1.000000e+00 : f32
    %31 = vector.broadcast %cst_21 : f32 to vector<2x32xf32>
    %32 = arith.subf %30, %31 : vector<2x32xf32>
    %cst_22 = arith.constant 1.67326319 : f32
    %33 = vector.broadcast %cst_22 : f32 to vector<2x32xf32>
    %34 = arith.mulf %33, %32 : vector<2x32xf32>
    %cst_23 = arith.constant 0.000000e+00 : f32
    %35 = vector.broadcast %cst_23 : f32 to vector<2x32xf32>
    %36 = arith.cmpf ogt, %27, %35 : vector<2x32xf32>
    %37 = arith.select %36, %27, %34 : vector<2x32xi1>, vector<2x32xf32>
    %cst_24 = arith.constant 1.05070102 : f32
    %38 = vector.broadcast %cst_24 : f32 to vector<2x32xf32>
    %39 = arith.mulf %38, %37 : vector<2x32xf32>
    %40 = arith.truncf %39 : vector<2x32xf32> to vector<2x32xbf16>
    %c0_25 = arith.constant 0 : index
    %c0_26 = arith.constant 0 : index
    %41 = vector.load %arg9[%c0_25, %c0_26] : memref<32x128xbf16, #tpu.memory_space<vmem>>, vector<32x128xbf16>
    %cst_27 = arith.constant dense<0.000000e+00> : vector<2x128xf32>
    %42 = tpu.matmul %40, %41, %cst_27 {dimension_numbers = #tpu.dot_dimension_numbers<[1], [0], [0], [1], [0, 0, 1, 1], [], []>} : vector<2x32xbf16>, vector<32x128xbf16>, vector<2x128xf32> -> vector<2x128xf32>
    %c0_28 = arith.constant 0 : index
    %c0_29 = arith.constant 0 : index
    %43 = vector.load %arg10[%c0_28, %c0_29] : memref<1x128xf32, #tpu.memory_space<vmem>>, vector<1x128xf32>
    %44 = vector.broadcast %43 : vector<1x128xf32> to vector<2x128xf32>
    %45 = arith.addf %42, %44 : vector<2x128xf32>
    %cst_30 = arith.constant 0.000000e+00 : f32
    %46 = vector.broadcast %cst_30 : f32 to vector<2x128xf32>
    %47 = arith.minimumf %45, %46 : vector<2x128xf32>
    %48 = math.exp %47 : vector<2x128xf32>
    %cst_31 = arith.constant 1.000000e+00 : f32
    %49 = vector.broadcast %cst_31 : f32 to vector<2x128xf32>
    %50 = arith.subf %48, %49 : vector<2x128xf32>
    %cst_32 = arith.constant 1.67326319 : f32
    %51 = vector.broadcast %cst_32 : f32 to vector<2x128xf32>
    %52 = arith.mulf %51, %50 : vector<2x128xf32>
    %cst_33 = arith.constant 0.000000e+00 : f32
    %53 = vector.broadcast %cst_33 : f32 to vector<2x128xf32>
    %54 = arith.cmpf ogt, %45, %53 : vector<2x128xf32>
    %55 = arith.select %54, %45, %52 : vector<2x128xi1>, vector<2x128xf32>
    %cst_34 = arith.constant 1.05070102 : f32
    %56 = vector.broadcast %cst_34 : f32 to vector<2x128xf32>
    %57 = arith.mulf %56, %55 : vector<2x128xf32>
    %c0_35 = arith.constant 0 : index
    %c0_36 = arith.constant 0 : index
    %58 = vector.load %arg24[%c0_35, %c0_36] : memref<2x128xf32, #tpu.memory_space<vmem>>, vector<2x128xf32>
    tpu.vector_store %arg24[%c0_35, %c0_36], %57 {strides = array<i32>} : memref<2x128xf32, #tpu.memory_space<vmem>>, vector<2x128xf32>,
    %c0_37 = arith.constant 0 : index
    %c0_38 = arith.constant 0 : index
    %59 = vector.load %arg2[%c0_37, %c0_38] : memref<2x64xbf16, #tpu.memory_space<vmem>>, vector<2x64xbf16>
    %c0_39 = arith.constant 0 : index
    %c0_40 = arith.constant 0 : index
    %60 = vector.load %arg11[%c0_39, %c0_40] : memref<64x32xbf16, #tpu.memory_space<vmem>>, vector<64x32xbf16>
    %cst_41 = arith.constant dense<0.000000e+00> : vector<2x32xf32>
    %61 = tpu.matmul %59, %60, %cst_41 {dimension_numbers = #tpu.dot_dimension_numbers<[1], [0], [0], [1], [0, 0, 1, 1], [], []>} : vector<2x64xbf16>, vector<64x32xbf16>, vector<2x32xf32> -> vector<2x32xf32>
    %c0_42 = arith.constant 0 : index
    %c0_43 = arith.constant 0 : index
    %62 = vector.load %arg12[%c0_42, %c0_43] : memref<32x32xbf16, #tpu.memory_space<vmem>>, vector<32x32xbf16>
    %cst_44 = arith.constant dense<0.000000e+00> : vector<2x32xf32>
    %63 = tpu.matmul %0, %62, %cst_44 {dimension_numbers = #tpu.dot_dimension_numbers<[1], [0], [0], [1], [0, 0, 1, 1], [], []>} : vector<2x32xbf16>, vector<32x32xbf16>, vector<2x32xf32> -> vector<2x32xf32>
    %64 = arith.addf %61, %63 : vector<2x32xf32>
    %c0_45 = arith.constant 0 : index
    %c0_46 = arith.constant 0 : index
    %65 = vector.load %arg13[%c0_45, %c0_46] : memref<1x32xf32, #tpu.memory_space<vmem>>, vector<1x32xf32>
    %66 = vector.broadcast %65 : vector<1x32xf32> to vector<2x32xf32>
    %67 = arith.addf %64, %66 : vector<2x32xf32>
    %cst_47 = arith.constant 0.000000e+00 : f32
    %68 = vector.broadcast %cst_47 : f32 to vector<2x32xf32>
    %69 = arith.minimumf %67, %68 : vector<2x32xf32>
    %70 = math.exp %69 : vector<2x32xf32>
    %cst_48 = arith.constant 1.000000e+00 : f32
    %71 = vector.broadcast %cst_48 : f32 to vector<2x32xf32>
    %72 = arith.subf %70, %71 : vector<2x32xf32>
    %cst_49 = arith.constant 1.67326319 : f32
    %73 = vector.broadcast %cst_49 : f32 to vector<2x32xf32>
    %74 = arith.mulf %73, %72 : vector<2x32xf32>
    %cst_50 = arith.constant 0.000000e+00 : f32
    %75 = vector.broadcast %cst_50 : f32 to vector<2x32xf32>
    %76 = arith.cmpf ogt, %67, %75 : vector<2x32xf32>
    %77 = arith.select %76, %67, %74 : vector<2x32xi1>, vector<2x32xf32>
    %cst_51 = arith.constant 1.05070102 : f32
    %78 = vector.broadcast %cst_51 : f32 to vector<2x32xf32>
    %79 = arith.mulf %78, %77 : vector<2x32xf32>
    %80 = arith.truncf %79 : vector<2x32xf32> to vector<2x32xbf16>
    %c0_52 = arith.constant 0 : index
    %c0_53 = arith.constant 0 : index
    %81 = vector.load %arg14[%c0_52, %c0_53] : memref<32x32xbf16, #tpu.memory_space<vmem>>, vector<32x32xbf16>
    %cst_54 = arith.constant dense<0.000000e+00> : vector<2x32xf32>
    %82 = tpu.matmul %80, %81, %cst_54 {dimension_numbers = #tpu.dot_dimension_numbers<[1], [0], [0], [1], [0, 0, 1, 1], [], []>} : vector<2x32xbf16>, vector<32x32xbf16>, vector<2x32xf32> -> vector<2x32xf32>
    %c0_55 = arith.constant 0 : index
    %c0_56 = arith.constant 0 : index
    %83 = vector.load %arg15[%c0_55, %c0_56] : memref<1x32xf32, #tpu.memory_space<vmem>>, vector<1x32xf32>
    %84 = vector.broadcast %83 : vector<1x32xf32> to vector<2x32xf32>
    %85 = arith.addf %82, %84 : vector<2x32xf32>
    %cst_57 = arith.constant 0.000000e+00 : f32
    %86 = vector.broadcast %cst_57 : f32 to vector<2x32xf32>
    %87 = arith.minimumf %85, %86 : vector<2x32xf32>
    %88 = math.exp %87 : vector<2x32xf32>
    %cst_58 = arith.constant 1.000000e+00 : f32
    %89 = vector.broadcast %cst_58 : f32 to vector<2x32xf32>
    %90 = arith.subf %88, %89 : vector<2x32xf32>
    %cst_59 = arith.constant 1.67326319 : f32
    %91 = vector.broadcast %cst_59 : f32 to vector<2x32xf32>
    %92 = arith.mulf %91, %90 : vector<2x32xf32>
    %cst_60 = arith.constant 0.000000e+00 : f32
    %93 = vector.broadcast %cst_60 : f32 to vector<2x32xf32>
    %94 = arith.cmpf ogt, %85, %93 : vector<2x32xf32>
    %95 = arith.select %94, %85, %92 : vector<2x32xi1>, vector<2x32xf32>
    %cst_61 = arith.constant 1.05070102 : f32
    %96 = vector.broadcast %cst_61 : f32 to vector<2x32xf32>
    %97 = arith.mulf %96, %95 : vector<2x32xf32>
    %98 = arith.truncf %97 : vector<2x32xf32> to vector<2x32xbf16>
    %c0_62 = arith.constant 0 : index
    %c0_63 = arith.constant 0 : index
    %99 = vector.load %arg16[%c0_62, %c0_63] : memref<32x64xbf16, #tpu.memory_space<vmem>>, vector<32x64xbf16>
    %cst_64 = arith.constant dense<0.000000e+00> : vector<2x64xf32>
    %100 = tpu.matmul %98, %99, %cst_64 {dimension_numbers = #tpu.dot_dimension_numbers<[1], [0], [0], [1], [0, 0, 1, 1], [], []>} : vector<2x32xbf16>, vector<32x64xbf16>, vector<2x64xf32> -> vector<2x64xf32>
    %c0_65 = arith.constant 0 : index
    %c0_66 = arith.constant 0 : index
    %101 = vector.load %arg17[%c0_65, %c0_66] : memref<1x64xf32, #tpu.memory_space<vmem>>, vector<1x64xf32>
    %102 = vector.broadcast %101 : vector<1x64xf32> to vector<2x64xf32>
    %103 = arith.addf %100, %102 : vector<2x64xf32>
    %cst_67 = arith.constant 0.000000e+00 : f32
    %104 = vector.broadcast %cst_67 : f32 to vector<2x64xf32>
    %105 = arith.minimumf %103, %104 : vector<2x64xf32>
    %106 = math.exp %105 : vector<2x64xf32>
    %cst_68 = arith.constant 1.000000e+00 : f32
    %107 = vector.broadcast %cst_68 : f32 to vector<2x64xf32>
    %108 = arith.subf %106, %107 : vector<2x64xf32>
    %cst_69 = arith.constant 1.67326319 : f32
    %109 = vector.broadcast %cst_69 : f32 to vector<2x64xf32>
    %110 = arith.mulf %109, %108 : vector<2x64xf32>
    %cst_70 = arith.constant 0.000000e+00 : f32
    %111 = vector.broadcast %cst_70 : f32 to vector<2x64xf32>
    %112 = arith.cmpf ogt, %103, %111 : vector<2x64xf32>
    %113 = arith.select %112, %103, %110 : vector<2x64xi1>, vector<2x64xf32>
    %cst_71 = arith.constant 1.05070102 : f32
    %114 = vector.broadcast %cst_71 : f32 to vector<2x64xf32>
    %115 = arith.mulf %114, %113 : vector<2x64xf32>
    %c0_72 = arith.constant 0 : index
    %c0_73 = arith.constant 0 : index
    %116 = vector.load %arg25[%c0_72, %c0_73] : memref<2x64xf32, #tpu.memory_space<vmem>>, vector<2x64xf32>
    tpu.vector_store %arg25[%c0_72, %c0_73], %115 {strides = array<i32>} : memref<2x64xf32, #tpu.memory_space<vmem>>, vector<2x64xf32>,
    %c0_74 = arith.constant 0 : index
    %c0_75 = arith.constant 0 : index
    %117 = vector.load %arg18[%c0_74, %c0_75] : memref<32x32xbf16, #tpu.memory_space<vmem>>, vector<32x32xbf16>
    %cst_76 = arith.constant dense<0.000000e+00> : vector<2x32xf32>
    %118 = tpu.matmul %0, %117, %cst_76 {dimension_numbers = #tpu.dot_dimension_numbers<[1], [0], [0], [1], [0, 0, 1, 1], [], []>} : vector<2x32xbf16>, vector<32x32xbf16>, vector<2x32xf32> -> vector<2x32xf32>
    %c0_77 = arith.constant 0 : index
    %c0_78 = arith.constant 0 : index
    %119 = vector.load %arg19[%c0_77, %c0_78] : memref<1x32xf32, #tpu.memory_space<vmem>>, vector<1x32xf32>
    %120 = vector.broadcast %119 : vector<1x32xf32> to vector<2x32xf32>
    %121 = arith.addf %118, %120 : vector<2x32xf32>
    %cst_79 = arith.constant 0.000000e+00 : f32
    %122 = vector.broadcast %cst_79 : f32 to vector<2x32xf32>
    %123 = arith.minimumf %121, %122 : vector<2x32xf32>
    %124 = math.exp %123 : vector<2x32xf32>
    %cst_80 = arith.constant 1.000000e+00 : f32
    %125 = vector.broadcast %cst_80 : f32 to vector<2x32xf32>
    %126 = arith.subf %124, %125 : vector<2x32xf32>
    %cst_81 = arith.constant 1.67326319 : f32
    %127 = vector.broadcast %cst_81 : f32 to vector<2x32xf32>
    %128 = arith.mulf %127, %126 : vector<2x32xf32>
    %cst_82 = arith.constant 0.000000e+00 : f32
    %129 = vector.broadcast %cst_82 : f32 to vector<2x32xf32>
    %130 = arith.cmpf ogt, %121, %129 : vector<2x32xf32>
    %131 = arith.select %130, %121, %128 : vector<2x32xi1>, vector<2x32xf32>
    %cst_83 = arith.constant 1.05070102 : f32
    %132 = vector.broadcast %cst_83 : f32 to vector<2x32xf32>
    %133 = arith.mulf %132, %131 : vector<2x32xf32>
    %134 = arith.truncf %133 : vector<2x32xf32> to vector<2x32xbf16>
    %c0_84 = arith.constant 0 : index
    %c0_85 = arith.constant 0 : index
    %135 = vector.load %arg20[%c0_84, %c0_85] : memref<32x32xbf16, #tpu.memory_space<vmem>>, vector<32x32xbf16>
    %cst_86 = arith.constant dense<0.000000e+00> : vector<2x32xf32>
    %136 = tpu.matmul %134, %135, %cst_86 {dimension_numbers = #tpu.dot_dimension_numbers<[1], [0], [0], [1], [0, 0, 1, 1], [], []>} : vector<2x32xbf16>, vector<32x32xbf16>, vector<2x32xf32> -> vector<2x32xf32>
    %c0_87 = arith.constant 0 : index
    %c0_88 = arith.constant 0 : index
    %137 = vector.load %arg21[%c0_87, %c0_88] : memref<1x32xf32, #tpu.memory_space<vmem>>, vector<1x32xf32>
    %138 = vector.broadcast %137 : vector<1x32xf32> to vector<2x32xf32>
    %139 = arith.addf %136, %138 : vector<2x32xf32>
    %cst_89 = arith.constant 0.000000e+00 : f32
    %140 = vector.broadcast %cst_89 : f32 to vector<2x32xf32>
    %141 = arith.minimumf %139, %140 : vector<2x32xf32>
    %142 = math.exp %141 : vector<2x32xf32>
    %cst_90 = arith.constant 1.000000e+00 : f32
    %143 = vector.broadcast %cst_90 : f32 to vector<2x32xf32>
    %144 = arith.subf %142, %143 : vector<2x32xf32>
    %cst_91 = arith.constant 1.67326319 : f32
    %145 = vector.broadcast %cst_91 : f32 to vector<2x32xf32>
    %146 = arith.mulf %145, %144 : vector<2x32xf32>
    %cst_92 = arith.constant 0.000000e+00 : f32
    %147 = vector.broadcast %cst_92 : f32 to vector<2x32xf32>
    %148 = arith.cmpf ogt, %139, %147 : vector<2x32xf32>
    %149 = arith.select %148, %139, %146 : vector<2x32xi1>, vector<2x32xf32>
    %cst_93 = arith.constant 1.05070102 : f32
    %150 = vector.broadcast %cst_93 : f32 to vector<2x32xf32>
    %151 = arith.mulf %150, %149 : vector<2x32xf32>
    %152 = arith.truncf %151 : vector<2x32xf32> to vector<2x32xbf16>
    %c0_94 = arith.constant 0 : index
    %c0_95 = arith.constant 0 : index
    %153 = vector.load %arg22[%c0_94, %c0_95] : memref<32x1xbf16, #tpu.memory_space<vmem>>, vector<32x1xbf16>
    %cst_96 = arith.constant dense<0.000000e+00> : vector<2x1xf32>
    %154 = tpu.matmul %152, %153, %cst_96 {dimension_numbers = #tpu.dot_dimension_numbers<[1], [0], [0], [1], [0, 0, 1, 1], [], []>} : vector<2x32xbf16>, vector<32x1xbf16>, vector<2x1xf32> -> vector<2x1xf32>
    %c0_97 = arith.constant 0 : index
    %c0_98 = arith.constant 0 : index
    %155 = vector.load %arg23[%c0_97, %c0_98] : memref<1x1xf32, #tpu.memory_space<vmem>>, vector<1x1xf32>
    %156 = vector.broadcast %155 : vector<1x1xf32> to vector<2x1xf32>
    %157 = arith.addf %154, %156 : vector<2x1xf32>
    %cst_99 = arith.constant 0.000000e+00 : f32
    %158 = vector.broadcast %cst_99 : f32 to vector<2x1xf32>
    %159 = arith.minimumf %157, %158 : vector<2x1xf32>
    %160 = math.exp %159 : vector<2x1xf32>
    %cst_100 = arith.constant 1.000000e+00 : f32
    %161 = vector.broadcast %cst_100 : f32 to vector<2x1xf32>
    %162 = arith.subf %160, %161 : vector<2x1xf32>
    %cst_101 = arith.constant 1.67326319 : f32
    %163 = vector.broadcast %cst_101 : f32 to vector<2x1xf32>
    %164 = arith.mulf %163, %162 : vector<2x1xf32>
    %cst_102 = arith.constant 0.000000e+00 : f32
    %165 = vector.broadcast %cst_102 : f32 to vector<2x1xf32>
    %166 = arith.cmpf ogt, %157, %165 : vector<2x1xf32>
    %167 = arith.select %166, %157, %164 : vector<2x1xi1>, vector<2x1xf32>
    %cst_103 = arith.constant 1.05070102 : f32
    %168 = vector.broadcast %cst_103 : f32 to vector<2x1xf32>
    %169 = arith.mulf %168, %167 : vector<2x1xf32>
    %c0_104 = arith.constant 0 : index
    %c0_105 = arith.constant 0 : index
    %170 = vector.load %arg26[%c0_104, %c0_105] : memref<2x1xf32, #tpu.memory_space<vmem>>, vector<2x1xf32>
    tpu.vector_store %arg26[%c0_104, %c0_105], %169 {strides = array<i32>} : memref<2x1xf32, #tpu.memory_space<vmem>>, vector<2x1xf32>,
    return
  }
  func.func @transform_0(%arg0: i32) -> (i32, i32) {
    %c0_i32 = arith.constant 0 : i32
    %c0_i32_0 = arith.constant 0 : i32
    return %arg0, %c0_i32 : i32, i32
  }
  func.func @transform_1(%arg0: i32) -> (i32, i32) {
    %c0_i32 = arith.constant 0 : i32
    %c0_i32_0 = arith.constant 0 : i32
    return %arg0, %c0_i32 : i32, i32
  }
  func.func @transform_2(%arg0: i32) -> (i32, i32) {
    %c0_i32 = arith.constant 0 : i32
    %c0_i32_0 = arith.constant 0 : i32
    return %arg0, %c0_i32 : i32, i32
  }
  func.func @transform_3(%arg0: i32) -> (i32, i32) {
    %c0_i32 = arith.constant 0 : i32
    %c0_i32_0 = arith.constant 0 : i32
    %c0_i32_1 = arith.constant 0 : i32
    return %c0_i32, %c0_i32_0 : i32, i32
  }
  func.func @transform_4(%arg0: i32) -> (i32, i32) {
    %c0_i32 = arith.constant 0 : i32
    %c0_i32_0 = arith.constant 0 : i32
    %c0_i32_1 = arith.constant 0 : i32
    return %c0_i32, %c0_i32_0 : i32, i32
  }
  func.func @transform_5(%arg0: i32) -> (i32, i32) {
    %c0_i32 = arith.constant 0 : i32
    %c0_i32_0 = arith.constant 0 : i32
    %c0_i32_1 = arith.constant 0 : i32
    return %c0_i32, %c0_i32_0 : i32, i32
  }
  func.func @transform_6(%arg0: i32) -> (i32, i32) {
    %c0_i32 = arith.constant 0 : i32
    %c0_i32_0 = arith.constant 0 : i32
    %c0_i32_1 = arith.constant 0 : i32
    return %c0_i32, %c0_i32_0 : i32, i32
  }
  func.func @transform_7(%arg0: i32) -> (i32, i32) {
    %c0_i32 = arith.constant 0 : i32
    %c0_i32_0 = arith.constant 0 : i32
    %c0_i32_1 = arith.constant 0 : i32
    return %c0_i32, %c0_i32_0 : i32, i32
  }
  func.func @transform_8(%arg0: i32) -> (i32, i32) {
    %c0_i32 = arith.constant 0 : i32
    %c0_i32_0 = arith.constant 0 : i32
    %c0_i32_1 = arith.constant 0 : i32
    return %c0_i32, %c0_i32_0 : i32, i32
  }
  func.func @transform_9(%arg0: i32) -> (i32, i32) {
    %c0_i32 = arith.constant 0 : i32
    %c0_i32_0 = arith.constant 0 : i32
    %c0_i32_1 = arith.constant 0 : i32
    return %c0_i32, %c0_i32_0 : i32, i32
  }
  func.func @transform_10(%arg0: i32) -> (i32, i32) {
    %c0_i32 = arith.constant 0 : i32
    %c0_i32_0 = arith.constant 0 : i32
    %c0_i32_1 = arith.constant 0 : i32
    return %c0_i32, %c0_i32_0 : i32, i32
  }
  func.func @transform_11(%arg0: i32) -> (i32, i32) {
    %c0_i32 = arith.constant 0 : i32
    %c0_i32_0 = arith.constant 0 : i32
    %c0_i32_1 = arith.constant 0 : i32
    return %c0_i32, %c0_i32_0 : i32, i32
  }
  func.func @transform_12(%arg0: i32) -> (i32, i32) {
    %c0_i32 = arith.constant 0 : i32
    %c0_i32_0 = arith.constant 0 : i32
    %c0_i32_1 = arith.constant 0 : i32
    return %c0_i32, %c0_i32_0 : i32, i32
  }
  func.func @transform_13(%arg0: i32) -> (i32, i32) {
    %c0_i32 = arith.constant 0 : i32
    %c0_i32_0 = arith.constant 0 : i32
    %c0_i32_1 = arith.constant 0 : i32
    return %c0_i32, %c0_i32_0 : i32, i32
  }
  func.func @transform_14(%arg0: i32) -> (i32, i32) {
    %c0_i32 = arith.constant 0 : i32
    %c0_i32_0 = arith.constant 0 : i32
    %c0_i32_1 = arith.constant 0 : i32
    return %c0_i32, %c0_i32_0 : i32, i32
  }
  func.func @transform_15(%arg0: i32) -> (i32, i32) {
    %c0_i32 = arith.constant 0 : i32
    %c0_i32_0 = arith.constant 0 : i32
    %c0_i32_1 = arith.constant 0 : i32
    return %c0_i32, %c0_i32_0 : i32, i32
  }
  func.func @transform_16(%arg0: i32) -> (i32, i32) {
    %c0_i32 = arith.constant 0 : i32
    %c0_i32_0 = arith.constant 0 : i32
    %c0_i32_1 = arith.constant 0 : i32
    return %c0_i32, %c0_i32_0 : i32, i32
  }
  func.func @transform_17(%arg0: i32) -> (i32, i32) {
    %c0_i32 = arith.constant 0 : i32
    %c0_i32_0 = arith.constant 0 : i32
    %c0_i32_1 = arith.constant 0 : i32
    return %c0_i32, %c0_i32_0 : i32, i32
  }
  func.func @transform_18(%arg0: i32) -> (i32, i32) {
    %c0_i32 = arith.constant 0 : i32
    %c0_i32_0 = arith.constant 0 : i32
    %c0_i32_1 = arith.constant 0 : i32
    return %c0_i32, %c0_i32_0 : i32, i32
  }
  func.func @transform_19(%arg0: i32) -> (i32, i32) {
    %c0_i32 = arith.constant 0 : i32
    %c0_i32_0 = arith.constant 0 : i32
    %c0_i32_1 = arith.constant 0 : i32
    return %c0_i32, %c0_i32_0 : i32, i32
  }
  func.func @transform_20(%arg0: i32) -> (i32, i32) {
    %c0_i32 = arith.constant 0 : i32
    %c0_i32_0 = arith.constant 0 : i32
    %c0_i32_1 = arith.constant 0 : i32
    return %c0_i32, %c0_i32_0 : i32, i32
  }
  func.func @transform_21(%arg0: i32) -> (i32, i32) {
    %c0_i32 = arith.constant 0 : i32
    %c0_i32_0 = arith.constant 0 : i32
    %c0_i32_1 = arith.constant 0 : i32
    return %c0_i32, %c0_i32_0 : i32, i32
  }
  func.func @transform_22(%arg0: i32) -> (i32, i32) {
    %c0_i32 = arith.constant 0 : i32
    %c0_i32_0 = arith.constant 0 : i32
    %c0_i32_1 = arith.constant 0 : i32
    return %c0_i32, %c0_i32_0 : i32, i32
  }
  func.func @transform_23(%arg0: i32) -> (i32, i32) {
    %c0_i32 = arith.constant 0 : i32
    %c0_i32_0 = arith.constant 0 : i32
    return %arg0, %c0_i32 : i32, i32
  }
  func.func @transform_24(%arg0: i32) -> (i32, i32) {
    %c0_i32 = arith.constant 0 : i32
    %c0_i32_0 = arith.constant 0 : i32
    return %arg0, %c0_i32 : i32, i32
  }
  func.func @transform_25(%arg0: i32) -> (i32, i32) {
    %c0_i32 = arith.constant 0 : i32
    %c0_i32_0 = arith.constant 0 : i32
    return %arg0, %c0_i32 : i32, i32
  }
}

</mosaic_0001>

<bundles_post_ra>
// kernel: global_readout_forward.2
= control target key start
LH: loop header
LB: loop body
LE: loop exit
PB: predicated region body
PF: predicated region fallthrough
CT: control target
= control target key end

     0   :  { %vm50_vm0 = vcmask 261120   ;;  %vm121_vm3 = vcmask 523264   ;;  %vm227_vm7 = vcmask 191488   ;;  %s401_s1 = inlined_call_operand.vmem [shape: bf16[32,64], index: 1, kind: input, shape index: {}]   ;;  %s402_s0 = inlined_call_operand.vmem [shape: f32[16,32], index: 0, kind: input, shape index: {}]   ;;  %s403_s2 = inlined_call_operand.vmem [shape: f32[1,64], index: 2, kind: input, shape index: {}]   ;;  %s404_s4 = inlined_call_operand.vmem [shape: f32[1,64], index: 4, kind: input, shape index: {}]   ;;  %s405_s3 = inlined_call_operand.vmem [shape: bf16[64,64], index: 3, kind: input, shape index: {}]   ;;  %s406_s6 = inlined_call_operand.vmem [shape: f32[1,24], index: 6, kind: input, shape index: {}]   ;;  %s407_s5 = inlined_call_operand.vmem [shape: bf16[64,24], index: 5, kind: input, shape index: {}]   ;;  %s408_s7 = inlined_call_operand.vmem [shape: bf16[16,24], index: 7, kind: output, shape index: {}]  }
   0x1   :  { %v284_v0 = vld [vmem:[%s401_s1 + $0x8] sm:$0xff]  ;;  %v283_v1 = vld [vmem:[%s401_s1] sm:$0xff]  ;;  %v288_v5 = vld [vmem:[%s405_s3 + $0x18] sm:$0xff] }
   0x2   :  { %60 = vmatpush.bf16.msra.mxu0 %v284_v0  ;;  %v27_v2 = vld [vmem:[%s402_s0] sm:$0xff]  ;;  %v28_v3 = vld [vmem:[%s402_s0 + $0x8] sm:$0xff]  ;;  %129 = vmatpush.bf16.msra.mxu1 %v288_v5  ;;  %v287_v6 = vld [vmem:[%s405_s3 + $0x10] sm:$0xff] }
   0x3   :  { %v29_v4 = vpack.c.bf16 %v28_v3, %v27_v2  ;;  %v286_v7 = vld [vmem:[%s405_s3 + $0x8] sm:$0xff]  ;;  %v285_v8 = vld [vmem:[%s405_s3] sm:$0xff]  ;;  %v292_v29 = vld [vmem:[%s407_s5 + $0x18] sm:$0xff] }
   0x4   :  { %v293_v9 = vld [vmem:[%s403_s2] ss:$0 sm:$0xff]  ;;  %199 = vmatpush.bf16.msra.mxu2 %v292_v29  ;;  %v291_v30 = vld [vmem:[%s407_s5 + $0x10] sm:$0xff]  ;;  %v290_v31 = vld [vmem:[%s407_s5 + $0x8] sm:$0xff] }
   0x5   :  { %v289_v32 = vld [vmem:[%s407_s5] sm:$0xff] }
   0x6   :  { %61 = vmatpush.bf16.msra.mxu0 %v283_v1  ;;  %130 = vmatpush.bf16.msra.mxu1 %v287_v6  ;;  %v294_v33 = vld [vmem:[%s404_s4] ss:$0 sm:$0xff] }
   0x7   :  { %v295_v53 = vld [vmem:[%s406_s6] ss:$0 sm:$0xff] }
   0x8   :  { %200 = vmatpush.bf16.msra.mxu2 %v291_v30 }
   0x9   :  { %242 = vmatmul.msk.bf16.vlgmr.msra.gmra.mxu0 %vm50_vm0, %v29_v4 }
   0xa   :  { %131 = vmatpush.bf16.msra.mxu1 %v286_v7 }
   0xc   :  { %201 = vmatpush.bf16.msra.mxu2 %v290_v31 }
   0xe   :  { %132 = vmatpush.bf16.msra.mxu1 %v285_v8 }
  0x10   :  { %202 = vmatpush.bf16.msra.mxu2 %v289_v32 }
  0x86   :  { %v63_v10 = vpop.f32.mrf.mxu0 }
  0x87   :  { %v64_v11 = vadd.f32 %v293_v9, %v63_v10 }
  0x89   :  { %v68_v12 = vmin.f32 %v64_v11, 0.0  ;;  %vm78_vm1 = vcmp.gt.f32.partialorder %v64_v11, 0.0 }
  0x8b   :  { %v70_v13 = vmul.f32 1.442695, %v68_v12 }
  0x8d   :  { %296 = vpow2.f32 %v70_v13 }
  0x8e   :  { %v65_v14 = vpop.f32.mrf.mxu0 }
  0x8f   :  { %v66_v15 = vadd.f32 %v293_v9, %v65_v14 }
  0x91   :  { %v69_v16 = vmin.f32 %v66_v15, 0.0  ;;  %vm79_vm2 = vcmp.gt.f32.partialorder %v66_v15, 0.0 }
  0x93   :  { %v297_v17 = vpop.eup %296  ;;  %v72_v18 = vmul.f32 1.442695, %v69_v16 }
  0x94   :  { %v243_v19 = vadd.f32 -1.0, %v297_v17 }
  0x95   :  { %298 = vpow2.f32 %v72_v18 }
  0x96   :  { %v76_v20 = vmul.f32 1.6732632, %v243_v19 }
  0x98   :  { %v80_v23 = vsel %vm78_vm1, %v64_v11, %v76_v20 }
  0x99   :  { %v82_v26 = vmul.f32 1.050701, %v80_v23 }
  0x9b   :  { %v299_v21 = vpop.eup %298 }
  0x9c   :  { %v244_v22 = vadd.f32 -1.0, %v299_v21 }
  0x9e   :  { %v77_v24 = vmul.f32 1.6732632, %v244_v22 }
  0xa0   :  { %v81_v25 = vsel %vm79_vm2, %v66_v15, %v77_v24 }
  0xa1   :  { %v83_v27 = vmul.f32 1.050701, %v81_v25 }
  0xa3   :  { %v84_v28 = vpack.c.bf16 %v83_v27, %v82_v26 }
  0xa5   :  { %261 = vmatmul.msk.bf16.vlgmr.msra.gmra.mxu1 %vm121_vm3, %v84_v28 }
 0x122   :  { %v134_v34 = vpop.f32.mrf.mxu1 }
 0x123   :  { %v135_v35 = vadd.f32 %v294_v33, %v134_v34 }
 0x125   :  { %v139_v36 = vmin.f32 %v135_v35, 0.0  ;;  %vm149_vm4 = vcmp.gt.f32.partialorder %v135_v35, 0.0 }
 0x127   :  { %v141_v37 = vmul.f32 1.442695, %v139_v36 }
 0x129   :  { %300 = vpow2.f32 %v141_v37 }
 0x12a   :  { %v136_v38 = vpop.f32.mrf.mxu1 }
 0x12b   :  { %v137_v39 = vadd.f32 %v294_v33, %v136_v38 }
 0x12d   :  { %v140_v40 = vmin.f32 %v137_v39, 0.0  ;;  %vm150_vm5 = vcmp.gt.f32.partialorder %v137_v39, 0.0 }
 0x12f   :  { %v301_v41 = vpop.eup %300  ;;  %v143_v42 = vmul.f32 1.442695, %v140_v40 }
 0x130   :  { %v262_v43 = vadd.f32 -1.0, %v301_v41 }
 0x131   :  { %302 = vpow2.f32 %v143_v42 }
 0x132   :  { %v147_v44 = vmul.f32 1.6732632, %v262_v43 }
 0x134   :  { %v151_v47 = vsel %vm149_vm4, %v135_v35, %v147_v44 }
 0x135   :  { %v153_v50 = vmul.f32 1.050701, %v151_v47 }
 0x137   :  { %v303_v45 = vpop.eup %302 }
 0x138   :  { %v263_v46 = vadd.f32 -1.0, %v303_v45 }
 0x13a   :  { %v148_v48 = vmul.f32 1.6732632, %v263_v46 }
 0x13c   :  { %v152_v49 = vsel %vm150_vm5, %v137_v39, %v148_v48 }
 0x13d   :  { %v154_v51 = vmul.f32 1.050701, %v152_v49 }
 0x13f   :  { %v155_v52 = vpack.c.bf16 %v154_v51, %v153_v50 }
 0x141   :  { %280 = vmatmul.msk.bf16.vlgmr.msra.gmra.mxu2 %vm121_vm3, %v155_v52 }
 0x1c4   :  { %v204_v54 = vpop.f32.mrf.mxu2 }
 0x1c5   :  { %v205_v55 = vadd.f32 %v295_v53, %v204_v54 }
 0x1c7   :  { %v209_v56 = vmin.f32 %v205_v55, 0.0  ;;  %vm219_vm6 = vcmp.gt.f32.partialorder %v205_v55, 0.0 }
 0x1c9   :  { %v211_v57 = vmul.f32 1.442695, %v209_v56 }
 0x1cb   :  { %304 = vpow2.f32 %v211_v57 }
 0x1cc   :  { %v206_v58 = vpop.f32.mrf.mxu2 }
 0x1cd   :  { %v207_v59 = vadd.f32 %v295_v53, %v206_v58 }
 0x1cf   :  { %v210_v60 = vmin.f32 %v207_v59, 0.0  ;;  %vm220_vm8 = vcmp.gt.f32.partialorder %v207_v59, 0.0 }
 0x1d1   :  { %v305_v61 = vpop.eup %304  ;;  %v213_v62 = vmul.f32 1.442695, %v210_v60 }
 0x1d2   :  { %v281_v63 = vadd.f32 -1.0, %v305_v61 }
 0x1d3   :  { %306 = vpow2.f32 %v213_v62 }
 0x1d4   :  { %v217_v0 = vmul.f32 1.6732632, %v281_v63 }
 0x1d6   :  { %v221_v1 = vsel %vm219_vm6, %v205_v55, %v217_v0 }
 0x1d7   :  { %v223_v2 = vmul.f32 1.050701, %v221_v1 }
 0x1d9   :  { %v307_v3 = vpop.eup %306  ;;  %v225_v4 = vpack.c.bf16 %v223_v2, %v223_v2 }
 0x1da   :  { %v282_v5 = vadd.f32 -1.0, %v307_v3 }
 0x1db   :  { %228 = vst.msk [vmem:[%s408_s7] sm:$0xf] %vm227_vm7, %v225_v4 }
 0x1dc   :  { %v218_v6 = vmul.f32 1.6732632, %v282_v5 }
 0x1de   :  { %v222_v7 = vsel %vm220_vm8, %v207_v59, %v218_v6 }
 0x1df   :  { %v224_v8 = vmul.f32 1.050701, %v222_v7 }
 0x1e1   :  { %v226_v9 = vpack.c.bf16 %v224_v8, %v224_v8 }
 0x1e3   :  { %229 = vst.msk [vmem:[%s408_s7 + $0x4] sm:$0xf] %vm227_vm7, %v226_v9 }

// kernel: global_readout_forward.3
= control target key start
LH: loop header
LB: loop body
LE: loop exit
PB: predicated region body
PF: predicated region fallthrough
CT: control target
= control target key end

     0   :  { %s1302_s0 = inlined_call_operand.vmem [shape: bf16[2,128], index: 0, kind: input, shape index: {}]   ;;  %s1303_s1 = inlined_call_operand.vmem [shape: bf16[2,64], index: 1, kind: input, shape index: {}]   ;;  %s1304_s2 = inlined_call_operand.vmem [shape: bf16[2,32], index: 2, kind: input, shape index: {}]   ;;  %s1305_s3 = inlined_call_operand.vmem [shape: bf16[128,32], index: 3, kind: input, shape index: {}]   ;;  %s1306_s4 = inlined_call_operand.vmem [shape: bf16[32,32], index: 4, kind: input, shape index: {}]   ;;  %s1307_s5 = inlined_call_operand.hbm [shape: f32[1,32], index: 5, kind: input, shape index: {}]   ;;  %s1308_s6 = inlined_call_operand.vmem [shape: bf16[32,32], index: 6, kind: input, shape index: {}]   ;;  %s1309_s7 = inlined_call_operand.hbm [shape: f32[1,32], index: 7, kind: input, shape index: {}]   ;;  %s1310_s8 = inlined_call_operand.vmem [shape: bf16[32,128], index: 8, kind: input, shape index: {}]   ;;  %s1311_s9 = inlined_call_operand.hbm [shape: f32[1,128], index: 9, kind: input, shape index: {}]   ;;  %s1312_s10 = inlined_call_operand.vmem [shape: bf16[64,32], index: 10, kind: input, shape index: {}]   ;;  %s1313_s11 = inlined_call_operand.vmem [shape: bf16[32,32], index: 11, kind: input, shape index: {}]   ;;  %s1314_s12 = inlined_call_operand.hbm [shape: f32[1,32], index: 12, kind: input, shape index: {}]   ;;  %s1315_s13 = inlined_call_operand.vmem [shape: bf16[32,32], index: 13, kind: input, shape index: {}]   ;;  %s1316_s14 = inlined_call_operand.hbm [shape: f32[1,32], index: 14, kind: input, shape index: {}]   ;;  %s1317_s15 = inlined_call_operand.vmem [shape: bf16[32,64], index: 15, kind: input, shape index: {}]   ;;  %s1318_s16 = inlined_call_operand.vmem [shape: f32[1,64], index: 16, kind: input, shape index: {}]   ;;  %s1319_s17 = inlined_call_operand.vmem [shape: bf16[32,32], index: 17, kind: input, shape index: {}]   ;;  %s1320_s18 = inlined_call_operand.vmem [shape: f32[1,32], index: 18, kind: input, shape index: {}]   ;;  %s1321_s19 = inlined_call_operand.vmem [shape: bf16[32,32], index: 19, kind: input, shape index: {}]   ;;  %s1322_s20 = inlined_call_operand.vmem [shape: f32[1,32], index: 20, kind: input, shape index: {}]   ;;  %s1323_s21 = inlined_call_operand.vmem [shape: bf16[32,1], index: 21, kind: input, shape index: {}]   ;;  %s1324_s22 = inlined_call_operand.<no memory space> [shape: f32[1,1], index: 22, kind: input, shape index: {}]   ;;  %s1325_s23 = inlined_call_operand.vmem [shape: f32[2,128], index: 23, kind: output, shape index: {0}]   ;;  %s1326_s24 = inlined_call_operand.vmem [shape: f32[2,64], index: 24, kind: output, shape index: {1}]   ;;  %s1327_s25 = inlined_call_operand.vmem [shape: f32[2,1], index: 25, kind: output, shape index: {2}]  }
   0x1   :  { %1332 = sst [smem:[#allocation14_spill]] %s1302_s0  ;;  %v31_v0 = vstv %s1324_s22 }
   0x2   :  { %1333 = sst [smem:[#allocation15_spill]] %s1303_s1  ;;  %32 = vst [vmem:[#allocation2] sm:$0x1] %v31_v0 }
   0x3   :  { %1334 = sst [smem:[#allocation16_spill]] %s1304_s2 }
   0x4   :  { %1335 = sst [smem:[#allocation17_spill]] %s1305_s3 }
   0x5   :  { %1336 = sst [smem:[#allocation18_spill]] %s1306_s4 }
   0x6   :  { %1337 = sst [smem:[#allocation19_spill]] %s1307_s5 }
   0x7   :  { %1338 = sst [smem:[#allocation20_spill]] %s1308_s6 }
   0x8   :  { %1339 = sst [smem:[#allocation21_spill]] %s1309_s7 }
   0x9   :  { %1340 = sst [smem:[#allocation22_spill]] %s1310_s8 }
   0xa   :  { %1341 = sst [smem:[#allocation23_spill]] %s1311_s9 }
   0xb   :  { %1342 = sst [smem:[#allocation24_spill]] %s1327_s25 }
   0xc   :  { %33 = vsyncpa [#allocation4], 0 }
   0xd   :  { %34 = vsyncpa [#allocation6], 0  ;;  %s1343_s7 = sld [smem:[#allocation21_spill]] }
  0x13   :  { %s64_s3 = sshll.u32 %s1343_s7, 4  ;;  %s65_s3 = int_to_ptr.hbm [resolvable:$true] %s64_s3 }
  0x14   :  { %35 = vsyncpa [#allocation9], 0  ;;  %s1023_s26 = smov [#allocation5]   ;;  %s92_s4 = sshll.u32 %s1314_s12, 4  ;;  %s93_s4 = int_to_ptr.hbm [resolvable:$true] %s92_s4 }
  0x15   :  { %s66_s1 = sshll.u32 %s1023_s26, 4  ;;  %s1024_s28 = smov [#allocation8]   ;;  %s67_s1 = int_to_ptr.vmem [resolvable:$true] %s66_s1 }
  0x16   :  { %69 = dma.hbm_to_vmem [thread:$0]  %s65_s3, 16, %s67_s1, [#allocation6]  }
  0x17   :  { %s94_s22 = sshll.u32 %s1024_s28, 4  ;;  %s1344_s0 = sld [smem:[#allocation19_spill]]  ;;  %s95_s22 = int_to_ptr.vmem [resolvable:$true] %s94_s22 }
  0x18   :  { %97 = dma.hbm_to_vmem [thread:$0]  %s93_s4, 16, %s95_s22, [#allocation9]  }
  0x19   :  { %s1345_s30 = sld [smem:[#allocation23_spill]]  ;;  %s1025_s26 = smov [#allocation3]  }
  0x1a   :  { %s53_s25 = sshll.u32 %s1025_s26, 4  ;;  %s1026_s12 = smov [#allocation7]   ;;  %s54_s25 = int_to_ptr.vmem [resolvable:$true] %s53_s25 }
  0x1b   :  { %s79_s3 = sshll.u32 %s1026_s12, 4  ;;  %s105_s27 = sshll.u32 %s1316_s14, 4  ;;  %s80_s3 = int_to_ptr.vmem [resolvable:$true] %s79_s3  ;;  %s106_s27 = int_to_ptr.hbm [resolvable:$true] %s105_s27 }
  0x1c   :  { %s1027_s28 = smov [#allocation10]  }
  0x1d   :  { %s51_s29 = sshll.u32 %s1344_s0, 4  ;;  %s107_s4 = sshll.u32 %s1027_s28, 4  ;;  %s52_s29 = int_to_ptr.hbm [resolvable:$true] %s51_s29  ;;  %s108_s4 = int_to_ptr.vmem [resolvable:$true] %s107_s4 }
  0x1e   :  { %56 = dma.hbm_to_vmem [thread:$0]  %s52_s29, 16, %s54_s25, [#allocation4]  }
  0x1f   :  { %s77_s7 = sshll.u32 %s1345_s30, 4  ;;  %s78_s7 = int_to_ptr.hbm [resolvable:$true] %s77_s7 }
  0x20   :  { %82 = dma.hbm_to_vmem [thread:$0]  %s78_s7, 16, %s80_s3, [#allocation6]  }
  0x21   :  { %110 = dma.hbm_to_vmem [thread:$0]  %s106_s27, 16, %s108_s4, [#allocation9]  }
  0x22   :  { %1017 = dma.done.wait [#allocation4], 16  }
  0x23   :  { %1018 = vsyncadd [#allocation4], 4294967280 }
  0x24   :  { %1019 = dma.done.wait [#allocation6], 32  }
  0x25   :  { %1020 = vsyncadd [#allocation6], 4294967264 }
  0x26   :  { %1021 = dma.done.wait [#allocation9], 32  }
  0x27   :  { %1022 = vsyncadd [#allocation9], 4294967264  ;;  %s1346_s9 = sld [smem:[#allocation17_spill]]  ;;  %vm182_vm0 = vcmask 261120   ;;  %v852_v17 = vld [vmem:[%s1312_s10 + $0x18] sm:$0xff]  ;;  %v854_v18 = vld [vmem:[%s1313_s11 + $0x8] sm:$0xff] }
  0x28   :  { %s1347_s14 = sld [smem:[#allocation18_spill]]  ;;  %v851_v19 = vld [vmem:[%s1312_s10 + $0x10] sm:$0xff]  ;;  %v853_v20 = vld [vmem:[%s1313_s11] sm:$0xff]  ;;  %v850_v21 = vld [vmem:[%s1312_s10 + $0x8] sm:$0xff]  ;;  %vm426_vm2 = vcmask 523264   ;;  %vm546_vm10 = vcmask 517120  }
  0x29   :  { %s1348_s1 = sld [smem:[#allocation16_spill]]  ;;  %v870_v22 = vld [vmem:[#allocation3] ss:$0 sm:$0xff]  ;;  %v860_v35 = vld [vmem:[%s1319_s17 + $0x8] sm:$0xff]  ;;  %v871_v43 = vld [vmem:[#allocation5] ss:$0 sm:$0xff] }
  0x2a   :  { %s1349_s30 = sld [smem:[#allocation14_spill]]  ;;  %v849_v25 = vld [vmem:[%s1312_s10] sm:$0xff]  ;;  %v856_v45 = vld [vmem:[%s1315_s13 + $0x8] sm:$0xff]  ;;  %vm679_vm12 = vcmask 1024  }
  0x2b   :  { %s1350_s12 = sld [smem:[#allocation20_spill]]  ;;  %v859_v37 = vld [vmem:[%s1319_s17] sm:$0xff]  ;;  %v862_v60 = vld [vmem:[%s1321_s19 + $0x8] sm:$0xff] }
  0x2c   :  { %s1352_s8 = sld [smem:[#allocation22_spill]]  ;;  %v855_v48 = vld [vmem:[%s1315_s13] sm:$0xff] }
  0x2d   :  { %v842_v1 = vld [vmem:[%s1346_s9 + $0x38] sm:$0xff]  ;;  %v841_v3 = vld [vmem:[%s1346_s9 + $0x30] sm:$0xff]  ;;  %v840_v5 = vld [vmem:[%s1346_s9 + $0x28] sm:$0xff] }
  0x2e   :  { %v844_v2 = vld [vmem:[%s1347_s14 + $0x8] sm:$0xff]  ;;  %247 = vmatpush.bf16.msra.mxu1 %v842_v1  ;;  %v843_v4 = vld [vmem:[%s1347_s14] sm:$0xff]  ;;  %v838_v8 = vld [vmem:[%s1346_s9 + $0x18] sm:$0xff] }
  0x2f   :  { %192 = vmatpush.bf16.msra.mxu0 %v844_v2  ;;  %v148_v6 = vld [vmem:[%s1348_s1] sm:$0x1]  ;;  %v837_v9 = vld [vmem:[%s1346_s9 + $0x10] sm:$0xff]  ;;  %v836_v10 = vld [vmem:[%s1346_s9 + $0x8] sm:$0xff] }
  0x30   :  { %v839_v7 = vld [vmem:[%s1346_s9 + $0x20] sm:$0xff] }
  0x31   :  { %v835_v11 = vld [vmem:[%s1346_s9] sm:$0xff]  ;;  %v846_v14 = vld [vmem:[%s1350_s12 + $0x8] sm:$0xff]  ;;  %s1353_s9 = sld [smem:[#allocation24_spill]] }
  0x32   :  { %248 = vmatpush.bf16.msra.mxu1 %v841_v3  ;;  %v149_v12 = vld [vmem:[%s1349_s30] sm:$0x1]  ;;  %303 = vmatpush.bf16.msra.mxu2 %v846_v14  ;;  %v848_v40 = vld [vmem:[%s1352_s8 + $0x8] sm:$0xff]  ;;  %v872_v53 = vld [vmem:[#allocation8] ss:$0 sm:$0xff] }
  0x33   :  { %193 = vmatpush.bf16.msra.mxu0 %v843_v4  ;;  %v845_v15 = vld [vmem:[%s1350_s12] sm:$0xff]  ;;  %s1351_s12 = sld [smem:[#allocation15_spill]]  ;;  %348 = vmatpush.bf16.msra.mxu3 %v848_v40 }
  0x34   :  { %v847_v42 = vld [vmem:[%s1352_s8] sm:$0xff] }
  0x35   :  { %v861_v1 = vld [vmem:[%s1321_s19] sm:$0xff] }
  0x36   :  { %249 = vmatpush.bf16.msra.mxu1 %v840_v5  ;;  %704 = vmatmul.msk.bf16.vlgmr.msra.gmra.mxu0 %vm182_vm0, %v148_v6  ;;  %v873_v2 = vld [vmem:[%s1320_s18] ss:$0 sm:$0xff] }
  0x37   :  { %304 = vmatpush.bf16.msra.mxu2 %v845_v15  ;;  %395 = vmatpush.bf16.msrb.mxu0 %v854_v18 }
  0x38   :  { %349 = vmatpush.bf16.msra.mxu3 %v847_v42  ;;  %v876_v42 = vld [vmem:[%s1322_s20] ss:$0 sm:$0xff] }
  0x39   :  { %v364_v38 = vld [vmem:[%s1351_s12] sm:$0x1] }
  0x3a   :  { %250 = vmatpush.bf16.msra.mxu1 %v839_v7 }
  0x3b   :  { %434 = vmatpush.bf16.msrb.mxu2 %v852_v17  ;;  %396 = vmatpush.bf16.msrb.mxu0 %v853_v20  ;;  %v874_v20 = vld [vmem:[#allocation7] ss:$0 sm:$0xff] }
  0x3c   :  { %486 = vmatpush.bf16.msrb.mxu3 %v856_v45 }
  0x3e   :  { %251 = vmatpush.bf16.msra.mxu1 %v838_v8 }
  0x3f   :  { %435 = vmatpush.bf16.msrb.mxu2 %v851_v19 }
  0x40   :  { %487 = vmatpush.bf16.msrb.mxu3 %v855_v48 }
  0x42   :  { %252 = vmatpush.bf16.msra.mxu1 %v837_v9 }
  0x43   :  { %436 = vmatpush.bf16.msrb.mxu2 %v850_v21 }
  0x46   :  { %253 = vmatpush.bf16.msra.mxu1 %v836_v10  ;;  %766 = vmatmul.msk.bf16.vlgmr.msrb.gmra.mxu0 %vm182_vm0, %v148_v6 }
  0x47   :  { %437 = vmatpush.bf16.msrb.mxu2 %v849_v25  ;;  %v857_v25 = vld [vmem:[%s1317_s15] sm:$0xff] }
  0x4a   :  { %254 = vmatpush.bf16.msra.mxu1 %v835_v11 }
  0x4d   :  { %255 = vmatmul.bf16.vlgmr.msra.gmra.mxu1 %v149_v12 }
  0xb3   :  { %v195_v13 = vpop.f32.mrf.mxu0 }
  0xbb   :  { %v197_v16 = vpop.f32.mrf.mxu0 }
  0xc3   :  { %v398_v39 = vpop.f32.mrf.mxu0 }
  0xca   :  { %v256_v23 = vpop.f32.mrf.mxu1 }
  0xcb   :  { %v257_v24 = vadd.f32 %v256_v23, %v195_v13  ;;  %v400_v41 = vpop.f32.mrf.mxu0 }
  0xcd   :  { %v264_v26 = vadd.f32 %v870_v22, %v257_v24  ;;  %v858_v22 = vld [vmem:[%s1317_s15 + $0x8] sm:$0xff] }
  0xce   :  { %531 = vmatpush.bf16.msra.mxu0 %v858_v22 }
  0xcf   :  { %v265_v27 = vmin.f32 %v264_v26, 0.0  ;;  %vm270_vm1 = vcmp.gt.f32.partialorder %v264_v26, 0.0 }
  0xd1   :  { %v266_v28 = vmul.f32 1.442695, %v265_v27 }
  0xd2   :  { %v258_v29 = vpop.f32.mrf.mxu1  ;;  %532 = vmatpush.bf16.msra.mxu0 %v857_v25 }
  0xd3   :  { %879 = vpow2.f32 %v266_v28 }
  0xd9   :  { %v880_v30 = vpop.eup %879 }
  0xda   :  { %v737_v31 = vadd.f32 -1.0, %v880_v30  ;;  %v875_v30 = vld [vmem:[#allocation10] ss:$0 sm:$0xff] }
  0xdc   :  { %v269_v32 = vmul.f32 1.6732632, %v737_v31 }
  0xde   :  { %v271_v33 = vsel %vm270_vm1, %v264_v26, %v269_v32  ;;  %v864_v32 = vld [vmem:[%s1323_s21 + $0x8] sm:$0xff] }
  0xdf   :  { %v272_v34 = vmul.f32 1.050701, %v271_v33  ;;  %664 = vmatpush.bf16.msrb.mxu1 %v864_v32 }
  0xe1   :  { %v273_v36 = vpack.c.bf16 %v272_v34, %v272_v34 }
  0xe3   :  { %746 = vmatmul.msk.bf16.vlgmr.msra.gmra.mxu2 %vm182_vm0, %v273_v36 }
  0xe4   :  { %574 = vmatpush.bf16.msra.mxu2 %v860_v35 }
  0xe8   :  { %575 = vmatpush.bf16.msra.mxu2 %v859_v37  ;;  %v863_v37 = vld [vmem:[%s1323_s21] sm:$0xff] }
  0xe9   :  { %665 = vmatpush.bf16.msrb.mxu1 %v863_v37 }
  0xf3   :  { %783 = vmatmul.msk.bf16.vlgmr.msrb.gmra.mxu2 %vm426_vm2, %v364_v38 }
 0x103   :  { %813 = vmatmul.msk.bf16.vlgmr.msra.gmra.mxu2 %vm182_vm0, %v148_v6 }
 0x166   :  { %v306_v44 = vpop.f32.mrf.mxu2 }
 0x167   :  { %v307_v46 = vadd.f32 %v871_v43, %v306_v44 }
 0x169   :  { %v310_v47 = vmin.f32 %v307_v46, 0.0  ;;  %vm315_vm3 = vcmp.gt.f32.partialorder %v307_v46, 0.0 }
 0x16b   :  { %v311_v49 = vmul.f32 1.442695, %v310_v47 }
 0x16d   :  { %881 = vpow2.f32 %v311_v49 }
 0x16e   :  { %v308_v50 = vpop.f32.mrf.mxu2 }
 0x173   :  { %v882_v51 = vpop.eup %881 }
 0x174   :  { %v747_v52 = vadd.f32 -1.0, %v882_v51 }
 0x176   :  { %v314_v54 = vmul.f32 1.6732632, %v747_v52  ;;  %v439_v55 = vpop.f32.mrf.mxu2 }
 0x177   :  { %v440_v56 = vadd.f32 %v439_v55, %v398_v39 }
 0x178   :  { %v316_v57 = vsel %vm315_vm3, %v307_v46, %v314_v54 }
 0x179   :  { %v447_v58 = vadd.f32 %v872_v53, %v440_v56  ;;  %v317_v59 = vmul.f32 1.050701, %v316_v57 }
 0x17b   :  { %v448_v61 = vmin.f32 %v447_v58, 0.0  ;;  %v318_v62 = vpack.c.bf16 %v317_v59, %v317_v59  ;;  %vm453_vm4 = vcmp.gt.f32.partialorder %v447_v58, 0.0  ;;  %v877_v59 = vld [vmem:[%s1318_s16] ss:$0 sm:$0xff] }
 0x17d   :  { %v449_v63 = vmul.f32 1.442695, %v448_v61  ;;  %756 = vmatmul.msk.bf16.vlgmr.msra.gmra.mxu3 %vm182_vm0, %v318_v62 }
 0x17e   :  { %v441_v0 = vpop.f32.mrf.mxu2  ;;  %619 = vmatpush.bf16.msra.mxu3 %v862_v60 }
 0x17f   :  { %883 = vpow2.f32 %v449_v63 }
 0x182   :  { %620 = vmatpush.bf16.msra.mxu3 %v861_v1 }
 0x185   :  { %v884_v3 = vpop.eup %883 }
 0x186   :  { %v784_v4 = vadd.f32 -1.0, %v884_v3  ;;  %v577_v5 = vpop.f32.mrf.mxu2 }
 0x187   :  { %v578_v6 = vadd.f32 %v873_v2, %v577_v5  ;;  %v878_v2 = vld [vmem:[#allocation2] ss:$0 sm:$0xff] }
 0x188   :  { %v452_v7 = vmul.f32 1.6732632, %v784_v4 }
 0x189   :  { %v581_v8 = vmin.f32 %v578_v6, 0.0  ;;  %vm586_vm5 = vcmp.gt.f32.partialorder %v578_v6, 0.0 }
 0x18a   :  { %v454_v9 = vsel %vm453_vm4, %v447_v58, %v452_v7 }
 0x18b   :  { %v455_v10 = vmul.f32 1.050701, %v454_v9  ;;  %v582_v11 = vmul.f32 1.442695, %v581_v8 }
 0x18d   :  { %885 = vpow2.f32 %v582_v11  ;;  %v456_v12 = vpack.c.bf16 %v455_v10, %v455_v10 }
 0x18e   :  { %v579_v13 = vpop.f32.mrf.mxu2 }
 0x18f   :  { %793 = vmatmul.msk.bf16.vlgmr.msrb.gmra.mxu3 %vm182_vm0, %v456_v12 }
 0x193   :  { %v886_v14 = vpop.eup %885 }
 0x194   :  { %v814_v15 = vadd.f32 -1.0, %v886_v14 }
 0x196   :  { %v585_v16 = vmul.f32 1.6732632, %v814_v15 }
 0x198   :  { %v587_v17 = vsel %vm586_vm5, %v578_v6, %v585_v16 }
 0x199   :  { %v588_v18 = vmul.f32 1.050701, %v587_v17 }
 0x19b   :  { %v589_v19 = vpack.c.bf16 %v588_v18, %v588_v18 }
 0x19f   :  { %823 = vmatmul.msk.bf16.vlgmr.msra.gmra.mxu3 %vm182_vm0, %v589_v19 }
 0x200   :  { %v351_v21 = vpop.f32.mrf.mxu3 }
 0x201   :  { %v352_v23 = vadd.f32 %v874_v20, %v351_v21 }
 0x203   :  { %v355_v24 = vmin.f32 %v352_v23, 0.0  ;;  %vm360_vm6 = vcmp.gt.f32.partialorder %v352_v23, 0.0 }
 0x205   :  { %v356_v26 = vmul.f32 1.442695, %v355_v24 }
 0x207   :  { %887 = vpow2.f32 %v356_v26 }
 0x208   :  { %v353_v27 = vpop.f32.mrf.mxu3 }
 0x20d   :  { %v888_v28 = vpop.eup %887 }
 0x20e   :  { %v757_v29 = vadd.f32 -1.0, %v888_v28 }
 0x210   :  { %v359_v31 = vmul.f32 1.6732632, %v757_v29 }
 0x212   :  { %v361_v33 = vsel %vm360_vm6, %v352_v23, %v359_v31  ;;  %v489_v34 = vpop.f32.mrf.mxu3 }
 0x213   :  { %v362_v35 = vmul.f32 1.050701, %v361_v33  ;;  %v490_v36 = vadd.f32 %v875_v30, %v489_v34 }
 0x215   :  { %363 = vst [vmem:[%s1325_s23] sm:$0x3] %v362_v35  ;;  %v493_v38 = vmin.f32 %v490_v36, 0.0  ;;  %vm498_vm7 = vcmp.gt.f32.partialorder %v490_v36, 0.0 }
 0x217   :  { %v494_v39 = vmul.f32 1.442695, %v493_v38 }
 0x219   :  { %889 = vpow2.f32 %v494_v39 }
 0x21a   :  { %v491_v40 = vpop.f32.mrf.mxu3 }
 0x21f   :  { %v890_v41 = vpop.eup %889 }
 0x220   :  { %v794_v43 = vadd.f32 -1.0, %v890_v41 }
 0x222   :  { %v497_v44 = vmul.f32 1.6732632, %v794_v43  ;;  %v622_v45 = vpop.f32.mrf.mxu3 }
 0x223   :  { %v623_v46 = vadd.f32 %v876_v42, %v622_v45 }
 0x224   :  { %v499_v47 = vsel %vm498_vm7, %v490_v36, %v497_v44 }
 0x225   :  { %v500_v48 = vmul.f32 1.050701, %v499_v47  ;;  %v626_v49 = vmin.f32 %v623_v46, 0.0  ;;  %vm631_vm8 = vcmp.gt.f32.partialorder %v623_v46, 0.0 }
 0x227   :  { %v501_v50 = vpack.c.bf16 %v500_v48, %v500_v48  ;;  %v627_v51 = vmul.f32 1.442695, %v626_v49 }
 0x229   :  { %891 = vpow2.f32 %v627_v51  ;;  %803 = vmatmul.msk.bf16.vlgmr.msra.gmra.mxu0 %vm182_vm0, %v501_v50 }
 0x22a   :  { %v624_v52 = vpop.f32.mrf.mxu3 }
 0x22f   :  { %v892_v53 = vpop.eup %891 }
 0x230   :  { %v824_v54 = vadd.f32 -1.0, %v892_v53 }
 0x232   :  { %v630_v55 = vmul.f32 1.6732632, %v824_v54 }
 0x234   :  { %v632_v56 = vsel %vm631_vm8, %v623_v46, %v630_v55 }
 0x235   :  { %v633_v57 = vmul.f32 1.050701, %v632_v56 }
 0x237   :  { %v634_v58 = vpack.c.bf16 %v633_v57, %v633_v57 }
 0x239   :  { %833 = vmatmul.msk.bf16.vlgmr.msrb.gmra.mxu1 %vm182_vm0, %v634_v58 }
 0x2a6   :  { %v534_v60 = vpop.f32.mrf.mxu0 }
 0x2a7   :  { %v535_v61 = vadd.f32 %v877_v59, %v534_v60 }
 0x2a9   :  { %v538_v62 = vmin.f32 %v535_v61, 0.0  ;;  %vm543_vm9 = vcmp.gt.f32.partialorder %v535_v61, 0.0 }
 0x2ab   :  { %v539_v63 = vmul.f32 1.442695, %v538_v62 }
 0x2ad   :  { %893 = vpow2.f32 %v539_v63 }
 0x2ae   :  { %v536_v0 = vpop.f32.mrf.mxu0 }
 0x2b3   :  { %v894_v1 = vpop.eup %893 }
 0x2b4   :  { %v804_v3 = vadd.f32 -1.0, %v894_v1 }
 0x2b6   :  { %v542_v4 = vmul.f32 1.6732632, %v804_v3  ;;  %v667_v5 = vpop.f32.mrf.mxu1 }
 0x2b7   :  { %v668_v6 = vadd.f32 %v878_v2, %v667_v5 }
 0x2b8   :  { %v544_v7 = vsel %vm543_vm9, %v535_v61, %v542_v4 }
 0x2b9   :  { %v545_v8 = vmul.f32 1.050701, %v544_v7  ;;  %v671_v9 = vmin.f32 %v668_v6, 0.0  ;;  %vm676_vm11 = vcmp.gt.f32.partialorder %v668_v6, 0.0 }
 0x2bb   :  { %547 = vst.msk [vmem:[%s1326_s24] sm:$0x3] %vm546_vm10, %v545_v8  ;;  %v672_v10 = vmul.f32 1.442695, %v671_v9 }
 0x2bd   :  { %895 = vpow2.f32 %v672_v10 }
 0x2be   :  { %v669_v11 = vpop.f32.mrf.mxu1 }
 0x2c3   :  { %v896_v12 = vpop.eup %895 }
 0x2c4   :  { %v834_v13 = vadd.f32 -1.0, %v896_v12 }
 0x2c6   :  { %v675_v14 = vmul.f32 1.6732632, %v834_v13 }
 0x2c8   :  { %v677_v15 = vsel %vm676_vm11, %v668_v6, %v675_v14 }
 0x2c9   :  { %v678_v16 = vmul.f32 1.050701, %v677_v15 }
 0x2cb   :  { %680 = vst.msk [vmem:[%s1353_s9] sm:$0x3] %vm679_vm12, %v678_v16 }
 0x2cc   :  { %693 = vsyncpa [#allocation4], 1 }
 0x2cd   :  { %694 = vsyncpa [#allocation6], 1 }
 0x2ce   :  { %695 = vsyncpa [#allocation9], 1 }

</bundles_post_ra>
